<compile_context>
chip_gen: v7x
topology: tpu7x:2x2x1
jax: 0.10.0
libtpu: 0.0.40
codegen_flags: <defaults>
</compile_context>

<pallas_src>
import jax
import jax.numpy as jnp
from jax.experimental import pallas as pl
from jax.experimental.pallas import tpu as pltpu

# ----------------------------- model hyper-params -----------------------------
EMB_DIM = 64                  # "sentence embedding dimension" (small synthetic SBERT)
NUM_SENT = 6                  # module concatenates 6 sentence embeddings
IN_DIM = EMB_DIM * NUM_SENT   # 384
H1, H2, H3 = 512, 256, 128    # hidden_size1/2/3 from the module
OUT_DIM = 1
OUT_PAD = 128                 # lane-dense padded output width (column 0 is the real output)
TILE_B = 256                  # batch rows per grid step (fits VMEM on v5e/v6e/v7x)


# ----------------------------- Pallas kernel ----------------------------------
def _mlp_kernel(x_ref, w1_ref, b1_ref, w2_ref, b2_ref, w3_ref, b3_ref,
                w4_ref, b4_ref, o_ref):
    # Layer 1: Linear(6D -> H1) + ReLU   (bf16 MXU inputs, f32 accumulate + elementwise)
    h = jnp.dot(x_ref[...], w1_ref[...], preferred_element_type=jnp.float32)
    h = jnp.maximum(h + b1_ref[...], 0.0)
    # Layer 2: Linear(H1 -> H2) + ReLU
    h = jnp.dot(h.astype(jnp.bfloat16), w2_ref[...], preferred_element_type=jnp.float32)
    h = jnp.maximum(h + b2_ref[...], 0.0)
    # Layer 3: Linear(H2 -> H3) + ReLU
    h = jnp.dot(h.astype(jnp.bfloat16), w3_ref[...], preferred_element_type=jnp.float32)
    h = jnp.maximum(h + b3_ref[...], 0.0)
    # Layer 4: Linear(H3 -> 1), padded to 128 lanes for an unmasked, lane-dense store.
    out = jnp.dot(h.astype(jnp.bfloat16), w4_ref[...],
                  preferred_element_type=jnp.float32) + b4_ref[...]
    o_ref[...] = out.astype(o_ref.dtype)


def sbert_regression_mlp(x, params, *, tile_b=TILE_B):
    """Run the MLP head of SBERTRegressionModel as a single batched Pallas kernel.

    x: [B, 6*EMB_DIM] float32 -- combined_features from the PyTorch forward.
    params: dict of f32 master weights w1,b1,...,w4,b4 (W stored [in, out], b [1, out]).
    Returns: [B, 1] float32.
    """
    B = x.shape[0]
    n_tiles = int(pl.cdiv(B, tile_b))
    b_pad = n_tiles * tile_b
    if b_pad != B:
        x = jnp.pad(x, ((0, b_pad - B), (0, 0)))
    x_bf = x.astype(jnp.bfloat16)

    # Weights -> bf16 (halve DMA bytes); biases stay f32 (tiny, keeps VPU math in f32).
    w1 = params["w1"].astype(jnp.bfloat16)
    w2 = params["w2"].astype(jnp.bfloat16)
    w3 = params["w3"].astype(jnp.bfloat16)
    b1, b2, b3 = params["b1"], params["b2"], params["b3"]
    # Final layer padded from 1 -> 128 output lanes (zeros beyond column 0).
    w4 = jnp.zeros((H3, OUT_PAD), jnp.bfloat16).at[:, :OUT_DIM].set(
        params["w4"].astype(jnp.bfloat16))
    b4 = jnp.zeros((1, OUT_PAD), jnp.float32).at[:, :OUT_DIM].set(params["b4"])

    def resident(shape):
        # Weights/biases: same block every grid step -> loaded once, VMEM-resident.
        return pl.BlockSpec(shape, lambda i: (0, 0))

    in_specs = [
        pl.BlockSpec((tile_b, IN_DIM), lambda i: (i, 0)),   # streaming activation tile
        resident((IN_DIM, H1)), resident((1, H1)),
        resident((H1, H2)),     resident((1, H2)),
        resident((H2, H3)),     resident((1, H3)),
        resident((H3, OUT_PAD)), resident((1, OUT_PAD)),
    ]
    out_specs = pl.BlockSpec((tile_b, OUT_PAD), lambda i: (i, 0))

    flops = 2 * b_pad * (IN_DIM * H1 + H1 * H2 + H2 * H3 + H3 * OUT_PAD)
    bytes_accessed = (
        b_pad * IN_DIM * 2                                        # bf16 activations in
        + (w1.size + w2.size + w3.size + w4.size) * 2             # bf16 weights
        + (b1.size + b2.size + b3.size + b4.size) * 4             # f32 biases
        + b_pad * OUT_PAD * 4                                     # f32 output
    )

    out = pl.pallas_call(
        _mlp_kernel,
        out_shape=jax.ShapeDtypeStruct((b_pad, OUT_PAD), jnp.float32),
        grid_spec=pltpu.PrefetchScalarGridSpec(
            num_scalar_prefetch=0,
            grid=(n_tiles,),
            in_specs=in_specs,
            out_specs=out_specs,
        ),
        compiler_params=pltpu.CompilerParams(
            dimension_semantics=("parallel",),       # shards batch tiles across TCs (v7x)
            vmem_limit_bytes=16 << 20,               # footprint ~3.5 MiB; fits v7x's 64 MiB
        ),
        cost_estimate=pl.CostEstimate(
            flops=int(flops), transcendentals=0, bytes_accessed=int(bytes_accessed)),
    )(x_bf, w1, b1, w2, b2, w3, b3, w4, b4)

    return out[:B, :OUT_DIM]


# ----------------------------- parameter init ---------------------------------
def init_params(key):
    """Deterministic synthetic init of the MLP parameters (shapes from __init__)."""
    ks = jax.random.split(key, 8)

    def lin(kw, kb, fin, fout):
        # PyTorch-style uniform(-1/sqrt(fin), 1/sqrt(fin)); weight stored [fin, fout].
        bound = 1.0 / jnp.sqrt(jnp.float32(fin))
        w = jax.random.uniform(kw, (fin, fout), jnp.float32, -bound, bound)
        b = jax.random.uniform(kb, (1, fout), jnp.float32, -bound, bound)
        return w, b

    w1, b1 = lin(ks[0], ks[1], IN_DIM, H1)
    w2, b2 = lin(ks[2], ks[3], H1, H2)
    w3, b3 = lin(ks[4], ks[5], H2, H3)
    w4, b4 = lin(ks[6], ks[7], H3, OUT_DIM)
    return dict(w1=w1, b1=b1, w2=w2, b2=b2, w3=w3, b3=b3, w4=w4, b4=b4)


def fake_sbert_encode(key, batch, num_sent, emb_dim):
    """Stand-in for `self.sbert.encode(...)` on each sentence.

    # TODO(synk): the real SBERT transformer encoder is an external pretrained model
    # with no clean Pallas equivalent here; we synthesize its per-sentence embeddings.
    Returns [batch, num_sent, emb_dim]; reshape mirrors torch.cat(embeddings, dim=1)
    -> combined_features of shape [batch, num_sent*emb_dim].
    """
    return jax.random.normal(key, (batch, num_sent, emb_dim), jnp.float32)


# ----------------------------- reference + main --------------------------------
def reference_mlp(x, p):
    """Pure-f32 reference of the MLP head (matches nn.Sequential semantics)."""
    h = jnp.maximum(x @ p["w1"] + p["b1"], 0.0)
    h = jnp.maximum(h @ p["w2"] + p["b2"], 0.0)
    h = jnp.maximum(h @ p["w3"] + p["b3"], 0.0)
    return h @ p["w4"] + p["b4"]


if __name__ == "__main__":
    key = jax.random.PRNGKey(0)
    k_emb, k_par = jax.random.split(key)

    B = 2  # two "sentence_list" inputs processed as a batch
    # sbert.encode(...) per sentence, then cat(dim=1) -> combined_features [B, 6*EMB_DIM]
    embeddings = fake_sbert_encode(k_emb, B, NUM_SENT, EMB_DIM)
    combined_features = embeddings.reshape(B, NUM_SENT * EMB_DIM)

    params = init_params(k_par)

    out = sbert_regression_mlp(combined_features, params)
    out = jax.block_until_ready(out)

    ref = reference_mlp(combined_features, params)
    assert out.shape == (B, OUT_DIM), out.shape
    # bf16 weights/activations inside the kernel -> looser tolerance than pure f32.
    assert jnp.allclose(out, ref, atol=5e-2, rtol=5e-2), (out, ref)

    print("KERNEL_OK")
</pallas_src>

<mosaic_0001>
module attributes {stable_mosaic.version = 11 : i64} {
  func.func @_mlp_kernel(%arg0: i32, %arg1: memref<256x384xbf16, #tpu.memory_space<vmem>>, %arg2: memref<384x512xbf16, #tpu.memory_space<vmem>>, %arg3: memref<1x512xf32, #tpu.memory_space<vmem>>, %arg4: memref<512x256xbf16, #tpu.memory_space<vmem>>, %arg5: memref<1x256xf32, #tpu.memory_space<vmem>>, %arg6: memref<256x128xbf16, #tpu.memory_space<vmem>>, %arg7: memref<1x128xf32, #tpu.memory_space<vmem>>, %arg8: memref<128x128xbf16, #tpu.memory_space<vmem>>, %arg9: memref<1x128xf32, #tpu.memory_space<vmem>>, %arg10: memref<256x128xf32, #tpu.memory_space<vmem>>) attributes {dimension_semantics = [#tpu.dimension_semantics<parallel>], iteration_bounds = array<i64: 1>, scalar_prefetch = 0 : i64, scratch_operands = 0 : i64, tpu.core_type = #tpu.core_type<tc>, window_params = [{transform_indices = @transform_0, window_bounds = array<i64: 256, 384>}, {pipeline_mode = #tpu.pipeline_mode<synchronous>, transform_indices = @transform_1, window_bounds = array<i64: 384, 512>}, {pipeline_mode = #tpu.pipeline_mode<synchronous>, transform_indices = @transform_2, window_bounds = array<i64: 1, 512>}, {pipeline_mode = #tpu.pipeline_mode<synchronous>, transform_indices = @transform_3, window_bounds = array<i64: 512, 256>}, {pipeline_mode = #tpu.pipeline_mode<synchronous>, transform_indices = @transform_4, window_bounds = array<i64: 1, 256>}, {pipeline_mode = #tpu.pipeline_mode<synchronous>, transform_indices = @transform_5, window_bounds = array<i64: 256, 128>}, {pipeline_mode = #tpu.pipeline_mode<synchronous>, transform_indices = @transform_6, window_bounds = array<i64: 1, 128>}, {pipeline_mode = #tpu.pipeline_mode<synchronous>, transform_indices = @transform_7, window_bounds = array<i64: 128, 128>}, {pipeline_mode = #tpu.pipeline_mode<synchronous>, transform_indices = @transform_8, window_bounds = array<i64: 1, 128>}, {transform_indices = @transform_9, window_bounds = array<i64: 256, 128>}]} {
    %c0 = arith.constant 0 : index
    %c0_0 = arith.constant 0 : index
    %0 = vector.load %arg1[%c0, %c0_0] : memref<256x384xbf16, #tpu.memory_space<vmem>>, vector<256x384xbf16>
    %c0_1 = arith.constant 0 : index
    %c0_2 = arith.constant 0 : index
    %1 = vector.load %arg2[%c0_1, %c0_2] : memref<384x512xbf16, #tpu.memory_space<vmem>>, vector<384x512xbf16>
    %cst = arith.constant dense<0.000000e+00> : vector<256x512xf32>
    %2 = tpu.matmul %0, %1, %cst {dimension_numbers = #tpu.dot_dimension_numbers<[1], [0], [0], [1], [0, 0, 1, 1], [], []>} : vector<256x384xbf16>, vector<384x512xbf16>, vector<256x512xf32> -> vector<256x512xf32>
    %c0_3 = arith.constant 0 : index
    %c0_4 = arith.constant 0 : index
    %3 = vector.load %arg3[%c0_3, %c0_4] : memref<1x512xf32, #tpu.memory_space<vmem>>, vector<1x512xf32>
    %4 = vector.broadcast %3 : vector<1x512xf32> to vector<256x512xf32>
    %5 = arith.addf %2, %4 : vector<256x512xf32>
    %cst_5 = arith.constant 0.000000e+00 : f32
    %6 = vector.broadcast %cst_5 : f32 to vector<256x512xf32>
    %7 = arith.maximumf %5, %6 : vector<256x512xf32>
    %8 = arith.truncf %7 : vector<256x512xf32> to vector<256x512xbf16>
    %c0_6 = arith.constant 0 : index
    %c0_7 = arith.constant 0 : index
    %9 = vector.load %arg4[%c0_6, %c0_7] : memref<512x256xbf16, #tpu.memory_space<vmem>>, vector<512x256xbf16>
    %cst_8 = arith.constant dense<0.000000e+00> : vector<256x256xf32>
    %10 = tpu.matmul %8, %9, %cst_8 {dimension_numbers = #tpu.dot_dimension_numbers<[1], [0], [0], [1], [0, 0, 1, 1], [], []>} : vector<256x512xbf16>, vector<512x256xbf16>, vector<256x256xf32> -> vector<256x256xf32>
    %c0_9 = arith.constant 0 : index
    %c0_10 = arith.constant 0 : index
    %11 = vector.load %arg5[%c0_9, %c0_10] : memref<1x256xf32, #tpu.memory_space<vmem>>, vector<1x256xf32>
    %12 = vector.broadcast %11 : vector<1x256xf32> to vector<256x256xf32>
    %13 = arith.addf %10, %12 : vector<256x256xf32>
    %cst_11 = arith.constant 0.000000e+00 : f32
    %14 = vector.broadcast %cst_11 : f32 to vector<256x256xf32>
    %15 = arith.maximumf %13, %14 : vector<256x256xf32>
    %16 = arith.truncf %15 : vector<256x256xf32> to vector<256x256xbf16>
    %c0_12 = arith.constant 0 : index
    %c0_13 = arith.constant 0 : index
    %17 = vector.load %arg6[%c0_12, %c0_13] : memref<256x128xbf16, #tpu.memory_space<vmem>>, vector<256x128xbf16>
    %cst_14 = arith.constant dense<0.000000e+00> : vector<256x128xf32>
    %18 = tpu.matmul %16, %17, %cst_14 {dimension_numbers = #tpu.dot_dimension_numbers<[1], [0], [0], [1], [0, 0, 1, 1], [], []>} : vector<256x256xbf16>, vector<256x128xbf16>, vector<256x128xf32> -> vector<256x128xf32>
    %c0_15 = arith.constant 0 : index
    %c0_16 = arith.constant 0 : index
    %19 = vector.load %arg7[%c0_15, %c0_16] : memref<1x128xf32, #tpu.memory_space<vmem>>, vector<1x128xf32>
    %20 = vector.broadcast %19 : vector<1x128xf32> to vector<256x128xf32>
    %21 = arith.addf %18, %20 : vector<256x128xf32>
    %cst_17 = arith.constant 0.000000e+00 : f32
    %22 = vector.broadcast %cst_17 : f32 to vector<256x128xf32>
    %23 = arith.maximumf %21, %22 : vector<256x128xf32>
    %24 = arith.truncf %23 : vector<256x128xf32> to vector<256x128xbf16>
    %c0_18 = arith.constant 0 : index
    %c0_19 = arith.constant 0 : index
    %25 = vector.load %arg8[%c0_18, %c0_19] : memref<128x128xbf16, #tpu.memory_space<vmem>>, vector<128x128xbf16>
    %cst_20 = arith.constant dense<0.000000e+00> : vector<256x128xf32>
    %26 = tpu.matmul %24, %25, %cst_20 {dimension_numbers = #tpu.dot_dimension_numbers<[1], [0], [0], [1], [0, 0, 1, 1], [], []>} : vector<256x128xbf16>, vector<128x128xbf16>, vector<256x128xf32> -> vector<256x128xf32>
    %c0_21 = arith.constant 0 : index
    %c0_22 = arith.constant 0 : index
    %27 = vector.load %arg9[%c0_21, %c0_22] : memref<1x128xf32, #tpu.memory_space<vmem>>, vector<1x128xf32>
    %28 = vector.broadcast %27 : vector<1x128xf32> to vector<256x128xf32>
    %29 = arith.addf %26, %28 : vector<256x128xf32>
    %c0_23 = arith.constant 0 : index
    %c0_24 = arith.constant 0 : index
    %30 = vector.load %arg10[%c0_23, %c0_24] : memref<256x128xf32, #tpu.memory_space<vmem>>, vector<256x128xf32>
    tpu.vector_store %arg10[%c0_23, %c0_24], %29 {strides = array<i32>} : memref<256x128xf32, #tpu.memory_space<vmem>>, vector<256x128xf32>,
    return
  }
  func.func @transform_0(%arg0: i32) -> (i32, i32) {
    %c0_i32 = arith.constant 0 : i32
    %c0_i32_0 = arith.constant 0 : i32
    return %arg0, %c0_i32 : i32, i32
  }
  func.func @transform_1(%arg0: i32) -> (i32, i32) {
    %c0_i32 = arith.constant 0 : i32
    %c0_i32_0 = arith.constant 0 : i32
    %c0_i32_1 = arith.constant 0 : i32
    return %c0_i32, %c0_i32_0 : i32, i32
  }
  func.func @transform_2(%arg0: i32) -> (i32, i32) {
    %c0_i32 = arith.constant 0 : i32
    %c0_i32_0 = arith.constant 0 : i32
    %c0_i32_1 = arith.constant 0 : i32
    return %c0_i32, %c0_i32_0 : i32, i32
  }
  func.func @transform_3(%arg0: i32) -> (i32, i32) {
    %c0_i32 = arith.constant 0 : i32
    %c0_i32_0 = arith.constant 0 : i32
    %c0_i32_1 = arith.constant 0 : i32
    return %c0_i32, %c0_i32_0 : i32, i32
  }
  func.func @transform_4(%arg0: i32) -> (i32, i32) {
    %c0_i32 = arith.constant 0 : i32
    %c0_i32_0 = arith.constant 0 : i32
    %c0_i32_1 = arith.constant 0 : i32
    return %c0_i32, %c0_i32_0 : i32, i32
  }
  func.func @transform_5(%arg0: i32) -> (i32, i32) {
    %c0_i32 = arith.constant 0 : i32
    %c0_i32_0 = arith.constant 0 : i32
    %c0_i32_1 = arith.constant 0 : i32
    return %c0_i32, %c0_i32_0 : i32, i32
  }
  func.func @transform_6(%arg0: i32) -> (i32, i32) {
    %c0_i32 = arith.constant 0 : i32
    %c0_i32_0 = arith.constant 0 : i32
    %c0_i32_1 = arith.constant 0 : i32
    return %c0_i32, %c0_i32_0 : i32, i32
  }
  func.func @transform_7(%arg0: i32) -> (i32, i32) {
    %c0_i32 = arith.constant 0 : i32
    %c0_i32_0 = arith.constant 0 : i32
    %c0_i32_1 = arith.constant 0 : i32
    return %c0_i32, %c0_i32_0 : i32, i32
  }
  func.func @transform_8(%arg0: i32) -> (i32, i32) {
    %c0_i32 = arith.constant 0 : i32
    %c0_i32_0 = arith.constant 0 : i32
    %c0_i32_1 = arith.constant 0 : i32
    return %c0_i32, %c0_i32_0 : i32, i32
  }
  func.func @transform_9(%arg0: i32) -> (i32, i32) {
    %c0_i32 = arith.constant 0 : i32
    %c0_i32_0 = arith.constant 0 : i32
    return %arg0, %c0_i32 : i32, i32
  }
}

</mosaic_0001>

<bundles_post_ra>
// kernel: tpu_custom_call.1
= control target key start
LH: loop header
LB: loop body
LE: loop exit
PB: predicated region body
PF: predicated region fallthrough
CT: control target
= control target key end

     0   :  { %14 = vsyncpa [#allocation3], 0  ;;  %s5651_s0 = inlined_call_operand.hbm [shape: bf16[256,384], index: 0, kind: input, shape index: {}]   ;;  %s5652_s1 = inlined_call_operand.hbm [shape: bf16[384,512], index: 1, kind: input, shape index: {}]   ;;  %s5653_s2 = inlined_call_operand.vmem [shape: f32[1,512], index: 2, kind: input, shape index: {}]   ;;  %s5654_s3 = inlined_call_operand.hbm [shape: bf16[512,256], index: 3, kind: input, shape index: {}]   ;;  %s5655_s4 = inlined_call_operand.vmem [shape: f32[1,256], index: 4, kind: input, shape index: {}]   ;;  %s5656_s5 = inlined_call_operand.hbm [shape: bf16[256,128], index: 5, kind: input, shape index: {}]   ;;  %s5657_s6 = inlined_call_operand.vmem [shape: f32[1,128], index: 6, kind: input, shape index: {}]   ;;  %s5658_s7 = inlined_call_operand.hbm [shape: bf16[128,128], index: 7, kind: input, shape index: {}]   ;;  %s5659_s8 = inlined_call_operand.vmem [shape: f32[1,128], index: 8, kind: input, shape index: {}]   ;;  %s5660_s9 = inlined_call_operand.hbm [shape: f32[256,128], index: 9, kind: output, shape index: {}]  }
   0x1   :  { %15 = vsyncpa [#allocation6], 0 }
   0x2   :  { %16 = vsyncpa [#allocation9], 0 }
   0x3   :  { %17 = vsyncpa [#allocation4], 0  ;;  %s4810_s30 = smov [#allocation5]   ;;  %s4670_s13 = scalar_lea.hbm %s5652_s1, 12288 }
   0x4   :  { %s35_s10 = sshll.u32 %s4810_s30, 4  ;;  %p4671_p0 = scmp.ne.s32.totalorder %s5652_s1, %s4670_s13  ;;  %s36_s10 = int_to_ptr.vmem [resolvable:$true] %s35_s10 }
   0x5   :  { %p4674_p1 = scmp.lt.u32.totalorder %s4670_s13, %s5652_s1 }
   0x7   :  { %p4676_p2 = pnand %p4674_p1, %p4671_p0 }
   0x9   :  { %4679 = shalt.err (!%p4676_p2)
}
   0xa   :  { %s4680_s18 = scalar_lea.vmem %s36_s10, 12288  ;;  %p4685_p4 = scmp.lt.s32.totalorder %s36_s10, %s36_s10 }
   0xb   :  { %p4681_p3 = scmp.ne.s32.totalorder %s36_s10, %s4680_s18  ;;  %p4686_p5 = scmp.lt.s32.totalorder %s4680_s18, %s4680_s18 }
   0xd   :  { %p4687_p6 = por %p4686_p5, %p4685_p4 }
   0xf   :  { %p4688_p7 = pnand %p4687_p6, %p4681_p3 }
  0x11   :  { %4691 = shalt.err (!%p4688_p7)
}
  0x12   :  { %s4811_s19 = smov 256   ;;  %s4812_s20 = smov 16  }
  0x13   :  { %41 = dma.hbm_to_vmem [thread:$0]  %s5652_s1, 12288, %s36_s10, [#allocation6], %s4811_s19, %s4811_s19, %s4812_s20  }
  0x14   :  { %s4813_s23 = smov [#allocation8]   ;;  %s4692_s27 = scalar_lea.hbm %s5656_s5, 2048 }
  0x15   :  { %s63_s24 = sshll.u32 %s4813_s23, 4  ;;  %p4693_p8 = scmp.ne.s32.totalorder %s5656_s5, %s4692_s27  ;;  %s64_s24 = int_to_ptr.vmem [resolvable:$true] %s63_s24 }
  0x16   :  { %p4696_p9 = scmp.lt.u32.totalorder %s4692_s27, %s5656_s5 }
  0x18   :  { %p4698_p10 = pnand %p4696_p9, %p4693_p8 }
  0x1a   :  { %4701 = shalt.err (!%p4698_p10)
}
  0x1b   :  { %s4702_s12 = scalar_lea.vmem %s64_s24, 2048  ;;  %p4707_p12 = scmp.lt.s32.totalorder %s64_s24, %s64_s24 }
  0x1c   :  { %p4703_p11 = scmp.ne.s32.totalorder %s64_s24, %s4702_s12  ;;  %p4708_p13 = scmp.lt.s32.totalorder %s4702_s12, %s4702_s12 }
  0x1e   :  { %p4709_p0 = por %p4708_p13, %p4707_p12 }
  0x20   :  { %p4710_p1 = pnand %p4709_p0, %p4703_p11 }
  0x22   :  { %4713 = shalt.err (!%p4710_p1)
}
  0x23   :  { %s4814_s1 = smov 64   ;;  %s4815_s10 = smov 4  }
  0x24   :  { %69 = dma.hbm_to_vmem [thread:$0]  %s5656_s5, 2048, %s64_s24, [#allocation9], %s4814_s1, %s4814_s1, %s4815_s10  }
  0x25   :  { %s4816_s15 = smov [#allocation2]   ;;  %s4714_s19 = scalar_lea.hbm %s5651_s0, 6144 }
  0x26   :  { %s23_s16 = sshll.u32 %s4816_s15, 4  ;;  %p4715_p2 = scmp.ne.s32.totalorder %s5651_s0, %s4714_s19  ;;  %s24_s16 = int_to_ptr.vmem [resolvable:$true] %s23_s16 }
  0x27   :  { %p4718_p3 = scmp.lt.u32.totalorder %s4714_s19, %s5651_s0 }
  0x29   :  { %p4720_p4 = pnand %p4718_p3, %p4715_p2 }
  0x2b   :  { %4723 = shalt.err (!%p4720_p4)
}
  0x2c   :  { %s4724_s25 = scalar_lea.vmem %s24_s16, 6144  ;;  %p4729_p6 = scmp.lt.s32.totalorder %s24_s16, %s24_s16 }
  0x2d   :  { %p4725_p5 = scmp.ne.s32.totalorder %s24_s16, %s4724_s25  ;;  %p4730_p7 = scmp.lt.s32.totalorder %s4724_s25, %s4724_s25 }
  0x2f   :  { %p4731_p8 = por %p4730_p7, %p4729_p6 }
  0x31   :  { %p4732_p9 = pnand %p4731_p8, %p4725_p5 }
  0x33   :  { %4735 = shalt.err (!%p4732_p9)
}
  0x34   :  { %s4817_s5 = smov 192   ;;  %s4818_s24 = smov 12  }
  0x35   :  { %29 = dma.hbm_to_vmem [thread:$0]  %s5651_s0, 6144, %s24_s16, [#allocation3], %s4817_s5, %s4817_s5, %s4818_s24  }
  0x36   :  { %s4819_s28 = smov [#allocation7]   ;;  %s4736_s12 = scalar_lea.hbm %s5654_s3, 8192 }
  0x37   :  { %s49_s29 = sshll.u32 %s4819_s28, 4  ;;  %p4737_p10 = scmp.ne.s32.totalorder %s5654_s3, %s4736_s12  ;;  %s50_s29 = int_to_ptr.vmem [resolvable:$true] %s49_s29 }
  0x38   :  { %p4740_p11 = scmp.lt.u32.totalorder %s4736_s12, %s5654_s3 }
  0x3a   :  { %p4742_p12 = pnand %p4740_p11, %p4737_p10 }
  0x3c   :  { %4745 = shalt.err (!%p4742_p12)
}
  0x3d   :  { %s4746_s18 = scalar_lea.vmem %s50_s29, 8192  ;;  %p4751_p0 = scmp.lt.s32.totalorder %s50_s29, %s50_s29 }
  0x3e   :  { %p4747_p13 = scmp.ne.s32.totalorder %s50_s29, %s4746_s18  ;;  %p4752_p1 = scmp.lt.s32.totalorder %s4746_s18, %s4746_s18 }
  0x40   :  { %p4753_p2 = por %p4752_p1, %p4751_p0 }
  0x42   :  { %p4754_p3 = pnand %p4753_p2, %p4747_p13 }
  0x44   :  { %4757 = shalt.err (!%p4754_p3)
}
  0x45   :  { %s4820_s0 = smov 128   ;;  %s4821_s16 = smov 8  }
  0x46   :  { %55 = dma.hbm_to_vmem [thread:$0]  %s5654_s3, 8192, %s50_s29, [#allocation6], %s4820_s0, %s4820_s0, %s4821_s16  }
  0x47   :  { %s4822_s21 = smov [#allocation10]   ;;  %s4758_s5 = scalar_lea.hbm %s5658_s7, 1024 }
  0x48   :  { %s77_s22 = sshll.u32 %s4822_s21, 4  ;;  %p4759_p4 = scmp.ne.s32.totalorder %s5658_s7, %s4758_s5  ;;  %s78_s22 = int_to_ptr.vmem [resolvable:$true] %s77_s22 }
  0x49   :  { %p4762_p5 = scmp.lt.u32.totalorder %s4758_s5, %s5658_s7 }
  0x4b   :  { %p4764_p6 = pnand %p4762_p5, %p4759_p4 }
  0x4d   :  { %4767 = shalt.err (!%p4764_p6)
}
  0x4e   :  { %s4768_s30 = scalar_lea.vmem %s78_s22, 1024  ;;  %p4773_p8 = scmp.lt.s32.totalorder %s78_s22, %s78_s22 }
  0x4f   :  { %p4769_p7 = scmp.ne.s32.totalorder %s78_s22, %s4768_s30  ;;  %p4774_p9 = scmp.lt.s32.totalorder %s4768_s30, %s4768_s30 }
  0x51   :  { %p4775_p10 = por %p4774_p9, %p4773_p8 }
  0x53   :  { %p4776_p11 = pnand %p4775_p10, %p4769_p7 }
  0x55   :  { %4779 = shalt.err (!%p4776_p11)
}
  0x56   :  { %83 = dma.hbm_to_vmem [thread:$0]  %s5658_s7, 1024, %s78_s22, [#allocation9], %s4814_s1, %s4814_s1, %s4815_s10  }
  0x57   :  { %4802 = dma.done.wait [#allocation3], 6144  }
  0x58   :  { %4803 = vsyncadd [#allocation3], 4294961152 }
  0x59   :  { %4804 = dma.done.wait [#allocation6], 20480  }
  0x5a   :  { %4805 = vsyncadd [#allocation6], 4294946816 }
  0x5b   :  { %4806 = dma.done.wait [#allocation9], 3072  }
  0x5c   :  { %4807 = vsyncadd [#allocation9], 4294964224  ;;  %v4823_v0 = vmov 0   ;;  %v4338_v1 = vld [vmem:[#allocation5 + $0x4] ss:$16 sps:$4 sm:$0xff]  }
  0x5d   :  { %1325 = vmatprep.mubr.bf16.mxu1 %v4823_v0  ;;  %v4945_v2 = vld [vmem:[#allocation5 + $0x204] ss:$16 sps:$4 sm:$0xff]   ;;  %1020 = vmatprep.subr.bf16.mxu0 %v4338_v1  ;;  %v4342_v3 = vld [vmem:[#allocation5] ss:$16 sps:$4 sm:$0xff]   ;;  %v4391_v34 = vld [vmem:[#allocation5 + $0xc] ss:$16 sps:$4 sm:$0xff]  }
  0x5e   :  { %v4947_v4 = vld [vmem:[#allocation5 + $0x200] ss:$16 sps:$4 sm:$0xff]   ;;  %3907 = vmatprep.subr.bf16.mxu1 %v4945_v2  ;;  %v4344_v5 = vld [vmem:[#allocation5 + $0x24] ss:$16 sps:$4 sm:$0xff]   ;;  %1021 = vmatpush1.bf16.msra.mxu0 %v4342_v3  ;;  %v4389_v36 = vld [vmem:[#allocation5 + $0x8] ss:$16 sps:$4 sm:$0xff]  }
  0x5f   :  { %3915 = vmatpush1.bf16.msra.mxu1 %v4947_v4  ;;  %v4951_v6 = vld [vmem:[#allocation5 + $0x224] ss:$16 sps:$4 sm:$0xff]   ;;  %v4348_v7 = vld [vmem:[#allocation5 + $0x20] ss:$16 sps:$4 sm:$0xff]   ;;  %1022 = vmatprep.subr.bf16.mxu0 %v4344_v5  ;;  %v4397_v39 = vld [vmem:[#allocation5 + $0x2c] ss:$16 sps:$4 sm:$0xff]  }
  0x60   :  { %v4953_v8 = vld [vmem:[#allocation5 + $0x220] ss:$16 sps:$4 sm:$0xff]   ;;  %3908 = vmatprep.subr.bf16.mxu1 %v4951_v6  ;;  %v4350_v9 = vld [vmem:[#allocation5 + $0x44] ss:$16 sps:$4 sm:$0xff]   ;;  %v4395_v40 = vld [vmem:[#allocation5 + $0x28] ss:$16 sps:$4 sm:$0xff]  }
  0x61   :  { %v4956_v10 = vld [vmem:[#allocation5 + $0x244] ss:$16 sps:$4 sm:$0xff]   ;;  %v4354_v11 = vld [vmem:[#allocation5 + $0x40] ss:$16 sps:$4 sm:$0xff]   ;;  %v4404_v43 = vld [vmem:[#allocation5 + $0x4c] ss:$16 sps:$4 sm:$0xff]  }
  0x62   :  { %v4958_v12 = vld [vmem:[#allocation5 + $0x240] ss:$16 sps:$4 sm:$0xff]   ;;  %1023 = vmatpush1.bf16.msra.mxu0 %v4348_v7  ;;  %v4356_v13 = vld [vmem:[#allocation5 + $0x64] ss:$16 sps:$4 sm:$0xff]   ;;  %v4402_v45 = vld [vmem:[#allocation5 + $0x48] ss:$16 sps:$4 sm:$0xff]  }
  0x63   :  { %3916 = vmatpush1.bf16.msra.mxu1 %v4953_v8  ;;  %1024 = vmatprep.subr.bf16.mxu0 %v4350_v9  ;;  %v4962_v14 = vld [vmem:[#allocation5 + $0x264] ss:$16 sps:$4 sm:$0xff]   ;;  %v4360_v15 = vld [vmem:[#allocation5 + $0x60] ss:$16 sps:$4 sm:$0xff]   ;;  %v4410_v48 = vld [vmem:[#allocation5 + $0x6c] ss:$16 sps:$4 sm:$0xff]  }
  0x64   :  { %3909 = vmatprep.subr.bf16.mxu1 %v4956_v10  ;;  %v4965_v16 = vld [vmem:[#allocation5 + $0x260] ss:$16 sps:$4 sm:$0xff]   ;;  %v4362_v17 = vld [vmem:[#allocation5 + $0x84] ss:$16 sps:$4 sm:$0xff]   ;;  %v4408_v49 = vld [vmem:[#allocation5 + $0x68] ss:$16 sps:$4 sm:$0xff]  }
  0x65   :  { %v4968_v18 = vld [vmem:[#allocation5 + $0x284] ss:$16 sps:$4 sm:$0xff]   ;;  %v4366_v19 = vld [vmem:[#allocation5 + $0x80] ss:$16 sps:$4 sm:$0xff]   ;;  %v4417_v52 = vld [vmem:[#allocation5 + $0x8c] ss:$16 sps:$4 sm:$0xff]  }
  0x66   :  { %1025 = vmatpush1.bf16.msra.mxu0 %v4354_v11  ;;  %v4970_v20 = vld [vmem:[#allocation5 + $0x280] ss:$16 sps:$4 sm:$0xff]   ;;  %v4368_v21 = vld [vmem:[#allocation5 + $0xa4] ss:$16 sps:$4 sm:$0xff]   ;;  %v4415_v54 = vld [vmem:[#allocation5 + $0x88] ss:$16 sps:$4 sm:$0xff]  }
  0x67   :  { %3917 = vmatpush1.bf16.msra.mxu1 %v4958_v12  ;;  %1026 = vmatprep.subr.bf16.mxu0 %v4356_v13  ;;  %v4974_v22 = vld [vmem:[#allocation5 + $0x2a4] ss:$16 sps:$4 sm:$0xff]   ;;  %v4372_v23 = vld [vmem:[#allocation5 + $0xa0] ss:$16 sps:$4 sm:$0xff]   ;;  %v4423_v58 = vld [vmem:[#allocation5 + $0xac] ss:$16 sps:$4 sm:$0xff]  }
  0x68   :  { %3910 = vmatprep.subr.bf16.mxu1 %v4962_v14  ;;  %v4977_v24 = vld [vmem:[#allocation5 + $0x2a0] ss:$16 sps:$4 sm:$0xff]   ;;  %v4374_v25 = vld [vmem:[#allocation5 + $0xc4] ss:$16 sps:$4 sm:$0xff]   ;;  %v4421_v59 = vld [vmem:[#allocation5 + $0xa8] ss:$16 sps:$4 sm:$0xff]  }
  0x69   :  { %v4980_v26 = vld [vmem:[#allocation5 + $0x2c4] ss:$16 sps:$4 sm:$0xff]   ;;  %v4378_v27 = vld [vmem:[#allocation5 + $0xc0] ss:$16 sps:$4 sm:$0xff]   ;;  %v4430_v62 = vld [vmem:[#allocation5 + $0xcc] ss:$16 sps:$4 sm:$0xff]  }
  0x6a   :  { %1027 = vmatpush1.bf16.msra.mxu0 %v4360_v15  ;;  %v4983_v28 = vld [vmem:[#allocation5 + $0x2c0] ss:$16 sps:$4 sm:$0xff]   ;;  %v4380_v29 = vld [vmem:[#allocation5 + $0xe4] ss:$16 sps:$4 sm:$0xff]   ;;  %v4428_v1 = vld [vmem:[#allocation5 + $0xc8] ss:$16 sps:$4 sm:$0xff]  }
  0x6b   :  { %3918 = vmatpush1.bf16.msra.mxu1 %v4965_v16  ;;  %1028 = vmatprep.subr.bf16.mxu0 %v4362_v17  ;;  %v4986_v30 = vld [vmem:[#allocation5 + $0x2e4] ss:$16 sps:$4 sm:$0xff]   ;;  %v4384_v31 = vld [vmem:[#allocation5 + $0xe0] ss:$16 sps:$4 sm:$0xff]   ;;  %v4436_v7 = vld [vmem:[#allocation5 + $0xec] ss:$16 sps:$4 sm:$0xff]  }
  0x6c   :  { %3911 = vmatprep.subr.bf16.mxu1 %v4968_v18  ;;  %v4988_v32 = vld [vmem:[#allocation5 + $0x2e0] ss:$16 sps:$4 sm:$0xff]   ;;  %v4386_v33 = vld [vmem:[#allocation5 + $0x104] ss:$16 sps:$4 sm:$0xff]   ;;  %v4434_v9 = vld [vmem:[#allocation5 + $0xe8] ss:$16 sps:$4 sm:$0xff]  }
  0x6d   :  { %v4388_v35 = vld [vmem:[#allocation2 + $0xc8] ss:$12 sps:$4 sm:$0xff]   ;;  %v4392_v37 = vld [vmem:[#allocation5 + $0x100] ss:$16 sps:$4 sm:$0xff]   ;;  %v4414_v53 = vld [vmem:[#allocation2 + $0xf8] ss:$12 sps:$4 sm:$0xff]  }
  0x6e   :  { %1029 = vmatpush1.bf16.msra.mxu0 %v4366_v19  ;;  %v4393_v38 = vld [vmem:[#allocation5 + $0x124] ss:$16 sps:$4 sm:$0xff]   ;;  %v4398_v41 = vld [vmem:[#allocation5 + $0x120] ss:$16 sps:$4 sm:$0xff]   ;;  %v4444_v13 = vld [vmem:[#allocation5 + $0x10c] ss:$16 sps:$4 sm:$0xff]  }
  0x6f   :  { %3919 = vmatpush1.bf16.msra.mxu1 %v4970_v20  ;;  %1030 = vmatprep.subr.bf16.mxu0 %v4368_v21  ;;  %v4399_v42 = vld [vmem:[#allocation5 + $0x144] ss:$16 sps:$4 sm:$0xff]   ;;  %v4401_v44 = vld [vmem:[#allocation2 + $0xe0] ss:$12 sps:$4 sm:$0xff]   ;;  %v4427_v63 = vld [vmem:[#allocation2 + $0x110] ss:$12 sps:$4 sm:$0xff]  }
  0x70   :  { %3912 = vmatprep.subr.bf16.mxu1 %v4974_v22  ;;  %v4405_v46 = vld [vmem:[#allocation5 + $0x140] ss:$16 sps:$4 sm:$0xff]   ;;  %v4406_v47 = vld [vmem:[#allocation5 + $0x164] ss:$16 sps:$4 sm:$0xff]   ;;  %v4442_v19 = vld [vmem:[#allocation5 + $0x108] ss:$16 sps:$4 sm:$0xff]  }
  0x71   :  { %v4411_v50 = vld [vmem:[#allocation5 + $0x160] ss:$16 sps:$4 sm:$0xff]   ;;  %v4412_v51 = vld [vmem:[#allocation5 + $0x184] ss:$16 sps:$4 sm:$0xff]   ;;  %v4447_v21 = vld [vmem:[#allocation5 + $0x12c] ss:$16 sps:$4 sm:$0xff]  }
  0x72   :  { %1031 = vmatpush1.bf16.msra.mxu0 %v4372_v23  ;;  %v4418_v55 = vld [vmem:[#allocation5 + $0x180] ss:$16 sps:$4 sm:$0xff]   ;;  %v4419_v57 = vld [vmem:[#allocation5 + $0x1a4] ss:$16 sps:$4 sm:$0xff]   ;;  %v5005_v23 = vld [vmem:[#allocation2 + $0x1c] ss:$12 sps:$4 sm:$0xff]  }
  0x73   :  { %3920 = vmatpush1.bf16.msra.mxu1 %v4977_v24  ;;  %1032 = vmatprep.subr.bf16.mxu0 %v4374_v25  ;;  %v4995_v56 = vld [vmem:[#allocation2 + $0x4] ss:$12 sps:$4 sm:$0xff]   ;;  %v4999_v15 = vld [vmem:[#allocation2] ss:$12 sps:$4 sm:$0xff]   ;;  %v5002_v17 = vld [vmem:[#allocation2 + $0x128] ss:$12 sps:$4 sm:$0xff]  }
  0x74   :  { %3913 = vmatprep.subr.bf16.mxu1 %v4980_v26  ;;  %1052 = vmatprep.mubr.bf16.mxu0 %v4995_v56  ;;  %v4424_v60 = vld [vmem:[#allocation5 + $0x1a0] ss:$16 sps:$4 sm:$0xff]   ;;  %v4425_v61 = vld [vmem:[#allocation5 + $0x1c4] ss:$16 sps:$4 sm:$0xff]   ;;  %v4445_v25 = vld [vmem:[#allocation5 + $0x128] ss:$16 sps:$4 sm:$0xff]  }
  0x75   :  { %v4431_v3 = vld [vmem:[#allocation5 + $0x1c0] ss:$16 sps:$4 sm:$0xff]   ;;  %v4432_v5 = vld [vmem:[#allocation5 + $0x1e4] ss:$16 sps:$4 sm:$0xff]  }
  0x76   :  { %1033 = vmatpush1.bf16.msra.mxu0 %v4378_v27  ;;  %v4437_v11 = vld [vmem:[#allocation5 + $0x1e0] ss:$16 sps:$4 sm:$0xff]   ;;  %v4454_v27 = vld [vmem:[#allocation5 + $0x14c] ss:$16 sps:$4 sm:$0xff]  }
  0x77   :  { %3921 = vmatpush1.bf16.msra.mxu1 %v4983_v28  ;;  %1034 = vmatprep.subr.bf16.mxu0 %v4380_v29  ;;  %v5012_v29 = vld [vmem:[#allocation2 + $0x18] ss:$12 sps:$4 sm:$0xff]  }
  0x78   :  { %3914 = vmatprep.subr.bf16.mxu1 %v4986_v30 }
  0x7a   :  { %1035 = vmatpush1.bf16.msra.mxu0 %v4384_v31  ;;  %v4452_v31 = vld [vmem:[#allocation5 + $0x148] ss:$16 sps:$4 sm:$0xff]  }
  0x7b   :  { %3922 = vmatpush1.bf16.msra.mxu1 %v4988_v32  ;;  %1036 = vmatprep.subr.bf16.mxu0 %v4386_v33  ;;  %v5017_v33 = vld [vmem:[#allocation2 + $0x34] ss:$12 sps:$4 sm:$0xff]  }
  0x7c   :  { %1406 = vmatprep.subr.bf16.mxu1 %v4391_v34  ;;  %v4455_v34 = vld [vmem:[#allocation5 + $0x168] ss:$16 sps:$4 sm:$0xff]  }
  0x7e   :  { %1326 = vmatmul.mubr.bf16.vlgmr.msra.gmra.mrb[0].mxu1 %v4388_v35  ;;  %1037 = vmatpush1.bf16.msra.mxu0 %v4392_v37  ;;  %v5025_v35 = vld [vmem:[#allocation2 + $0x30] ss:$12 sps:$4 sm:$0xff]  }
  0x7f   :  { %1407 = vmatpush1.bf16.msra.mxu1 %v4389_v36  ;;  %1038 = vmatprep.subr.bf16.mxu0 %v4393_v38  ;;  %v4462_v36 = vld [vmem:[#allocation5 + $0x188] ss:$16 sps:$4 sm:$0xff]   ;;  %v4467_v37 = vld [vmem:[#allocation5 + $0x1ac] ss:$16 sps:$4 sm:$0xff]  }
  0x80   :  { %1408 = vmatprep.subr.bf16.mxu1 %v4397_v39  ;;  %1335 = vmatprep.mubr.bf16.mxu1 %v4823_v0  ;;  %v4465_v38 = vld [vmem:[#allocation5 + $0x1a8] ss:$16 sps:$4 sm:$0xff]   ;;  %v5041_v39 = vld [vmem:[#allocation2 + $0x170] ss:$12 sps:$4 sm:$0xff]  }
  0x82   :  { %1039 = vmatpush1.bf16.msra.mxu0 %v4398_v41  ;;  %v4477_v41 = vld [vmem:[#allocation5 + $0x1ec] ss:$16 sps:$4 sm:$0xff]  }
  0x83   :  { %1409 = vmatpush1.bf16.msra.mxu1 %v4395_v40  ;;  %1040 = vmatprep.subr.bf16.mxu0 %v4399_v42  ;;  %v5044_v40 = vld [vmem:[#allocation2 + $0x64] ss:$12 sps:$4 sm:$0xff]   ;;  %v4475_v42 = vld [vmem:[#allocation5 + $0x1e8] ss:$16 sps:$4 sm:$0xff]  }
  0x84   :  { %1410 = vmatprep.subr.bf16.mxu1 %v4404_v43  ;;  %v4515_v43 = vld [vmem:[#allocation5 + $0x208] ss:$16 sps:$4 sm:$0xff]  }
  0x86   :  { %1336 = vmatmul.mubr.bf16.gmra.mrb[4].mxu1 %v4401_v44  ;;  %1041 = vmatpush1.bf16.msra.mxu0 %v4405_v46  ;;  %v4520_v44 = vld [vmem:[#allocation5 + $0x22c] ss:$16 sps:$4 sm:$0xff]  }
  0x87   :  { %1411 = vmatpush1.bf16.msra.mxu1 %v4402_v45  ;;  %1042 = vmatprep.subr.bf16.mxu0 %v4406_v47  ;;  %v4518_v45 = vld [vmem:[#allocation5 + $0x228] ss:$16 sps:$4 sm:$0xff]   ;;  %v4524_v46 = vld [vmem:[#allocation5 + $0x24c] ss:$16 sps:$4 sm:$0xff]  }
  0x88   :  { %1412 = vmatprep.subr.bf16.mxu1 %v4410_v48  ;;  %1345 = vmatprep.mubr.bf16.mxu1 %v4823_v0  ;;  %v4483_v47 = vld [vmem:[#allocation2 + $0x78] ss:$12 sps:$4 sm:$0xff]   ;;  %v4527_v48 = vld [vmem:[#allocation5 + $0x26c] ss:$16 sps:$4 sm:$0xff]  }
  0x8a   :  { %1043 = vmatpush1.bf16.msra.mxu0 %v4411_v50  ;;  %v4486_v50 = vld [vmem:[#allocation2 + $0x90] ss:$12 sps:$4 sm:$0xff]  }
  0x8b   :  { %1413 = vmatpush1.bf16.msra.mxu1 %v4408_v49  ;;  %1044 = vmatprep.subr.bf16.mxu0 %v4412_v51  ;;  %v4531_v49 = vld [vmem:[#allocation5 + $0x28c] ss:$16 sps:$4 sm:$0xff]   ;;  %v4529_v51 = vld [vmem:[#allocation5 + $0x288] ss:$16 sps:$4 sm:$0xff]  }
  0x8c   :  { %1414 = vmatprep.subr.bf16.mxu1 %v4417_v52  ;;  %v4534_v52 = vld [vmem:[#allocation5 + $0x2ac] ss:$16 sps:$4 sm:$0xff]  }
  0x8e   :  { %1346 = vmatmul.mubr.bf16.gmra.mrb[8].mxu1 %v4414_v53  ;;  %1045 = vmatpush1.bf16.msra.mxu0 %v4418_v55  ;;  %v4538_v53 = vld [vmem:[#allocation5 + $0x2cc] ss:$16 sps:$4 sm:$0xff]   ;;  %v4490_v55 = vld [vmem:[#allocation2 + $0xc4] ss:$12 sps:$4 sm:$0xff]  }
  0x8f   :  { %1415 = vmatpush1.bf16.msra.mxu1 %v4415_v54  ;;  %1046 = vmatprep.subr.bf16.mxu0 %v4419_v57  ;;  %v4489_v54 = vld [vmem:[#allocation2 + $0xa8] ss:$12 sps:$4 sm:$0xff]   ;;  %v4541_v57 = vld [vmem:[#allocation5 + $0x2ec] ss:$16 sps:$4 sm:$0xff]  }
  0x90   :  { %1416 = vmatprep.subr.bf16.mxu1 %v4423_v58  ;;  %1355 = vmatprep.mubr.bf16.mxu1 %v4823_v0  ;;  %v4539_v58 = vld [vmem:[#allocation5 + $0x2e8] ss:$16 sps:$4 sm:$0xff]  }
  0x92   :  { %1047 = vmatpush1.bf16.msra.mxu0 %v4424_v60  ;;  %v4493_v60 = vld [vmem:[#allocation2 + $0xdc] ss:$12 sps:$4 sm:$0xff]  }
  0x93   :  { %1417 = vmatpush1.bf16.msra.mxu1 %v4421_v59  ;;  %1048 = vmatprep.subr.bf16.mxu0 %v4425_v61  ;;  %v4492_v59 = vld [vmem:[#allocation2 + $0xc0] ss:$12 sps:$4 sm:$0xff]   ;;  %v4495_v61 = vld [vmem:[#allocation2 + $0xd8] ss:$12 sps:$4 sm:$0xff]  }
  0x94   :  { %1418 = vmatprep.subr.bf16.mxu1 %v4430_v62  ;;  %v4496_v62 = vld [vmem:[#allocation2 + $0xf4] ss:$12 sps:$4 sm:$0xff]  }
  0x96   :  { %1356 = vmatmul.mubr.bf16.gmra.mrb[12].mxu1 %v4427_v63  ;;  %1049 = vmatpush1.bf16.msra.mxu0 %v4431_v3  ;;  %v4498_v63 = vld [vmem:[#allocation2 + $0xf0] ss:$12 sps:$4 sm:$0xff]   ;;  %v4501_v3 = vld [vmem:[#allocation2 + $0x108] ss:$12 sps:$4 sm:$0xff]  }
  0x97   :  { %1419 = vmatpush1.bf16.msra.mxu1 %v4428_v1  ;;  %1050 = vmatprep.subr.bf16.mxu0 %v4432_v5  ;;  %v4499_v1 = vld [vmem:[#allocation2 + $0x10c] ss:$12 sps:$4 sm:$0xff]   ;;  %v4502_v5 = vld [vmem:[#allocation2 + $0x124] ss:$12 sps:$4 sm:$0xff]  }
  0x98   :  { %1420 = vmatprep.subr.bf16.mxu1 %v4436_v7  ;;  %1365 = vmatprep.mubr.bf16.mxu1 %v4823_v0  ;;  %v4504_v7 = vld [vmem:[#allocation2 + $0x120] ss:$12 sps:$4 sm:$0xff]  }
  0x9a   :  { %1051 = vmatpush1.bf16.msra.mxu0 %v4437_v11  ;;  %v4507_v11 = vld [vmem:[#allocation2 + $0x138] ss:$12 sps:$4 sm:$0xff]  }
  0x9b   :  { %1421 = vmatpush1.bf16.msra.mxu1 %v4434_v9  ;;  %1213 = vmatprep.subr.bf16.mxu0 %v4945_v2  ;;  %v5015_v2 = vld [vmem:[#allocation2 + $0x140] ss:$12 sps:$4 sm:$0xff]   ;;  %v4505_v9 = vld [vmem:[#allocation2 + $0x13c] ss:$12 sps:$4 sm:$0xff]  }
  0x9c   :  { %1422 = vmatprep.subr.bf16.mxu1 %v4444_v13  ;;  %v4508_v13 = vld [vmem:[#allocation2 + $0x154] ss:$12 sps:$4 sm:$0xff]  }
  0x9d   :  { %1053 = vmatmul.mubr.bf16.vlgmr.msra.gmra.mrb[0].mxu0 %v4999_v15 }
  0x9e   :  { %1366 = vmatmul.mubr.bf16.gmra.mrb[16].mxu1 %v5002_v17  ;;  %1214 = vmatpush1.bf16.msra.mxu0 %v4947_v4  ;;  %v4457_v4 = vld [vmem:[#allocation5 + $0x16c] ss:$16 sps:$4 sm:$0xff]  }
  0x9f   :  { %1423 = vmatpush1.bf16.msra.mxu1 %v4442_v19  ;;  %1062 = vmatprep.mubr.bf16.mxu0 %v5005_v23  ;;  %v4511_v19 = vld [vmem:[#allocation2 + $0x16c] ss:$12 sps:$4 sm:$0xff]  }
  0xa0   :  { %1424 = vmatprep.subr.bf16.mxu1 %v4447_v21  ;;  %1375 = vmatprep.mubr.bf16.mxu1 %v4823_v0  ;;  %v4513_v21 = vld [vmem:[#allocation2 + $0x168] ss:$12 sps:$4 sm:$0xff]  }
  0xa1   :  { %1215 = vmatprep.subr.bf16.mxu0 %v4951_v6  ;;  %v4464_v6 = vld [vmem:[#allocation5 + $0x18c] ss:$16 sps:$4 sm:$0xff]  }
  0xa2   :  { %1216 = vmatpush1.bf16.msra.mxu0 %v4953_v8  ;;  %v5028_v8 = vld [vmem:[#allocation2 + $0x158] ss:$12 sps:$4 sm:$0xff]  }
  0xa3   :  { %1425 = vmatpush1.bf16.msra.mxu1 %v4445_v25  ;;  %1217 = vmatprep.subr.bf16.mxu0 %v4956_v10  ;;  %v5031_v10 = vld [vmem:[#allocation2 + $0x4c] ss:$12 sps:$4 sm:$0xff]  }
  0xa4   :  { %1426 = vmatprep.subr.bf16.mxu1 %v4454_v27  ;;  %v4521_v25 = vld [vmem:[#allocation2 + $0x20] ss:$12 sps:$4 sm:$0xff]   ;;  %v4528_v27 = vld [vmem:[#allocation2 + $0x38] ss:$12 sps:$4 sm:$0xff]  }
  0xa5   :  { %1063 = vmatmul.mubr.bf16.gmra.mrb[4].mxu0 %v5012_v29 }
  0xa6   :  { %1376 = vmatmul.mubr.bf16.gmra.mrb[20].mxu1 %v5015_v2  ;;  %1072 = vmatprep.mubr.bf16.mxu0 %v5017_v33 }
  0xa7   :  { %1427 = vmatpush1.bf16.msra.mxu1 %v4452_v31  ;;  %1385 = vmatprep.mubr.bf16.mxu1 %v4823_v0  ;;  %v4542_v31 = vld [vmem:[#allocation2 + $0x68] ss:$12 sps:$4 sm:$0xff]  }
  0xa8   :  { %1428 = vmatprep.subr.bf16.mxu1 %v4457_v4  ;;  %1218 = vmatpush1.bf16.msra.mxu0 %v4958_v12  ;;  %v4474_v12 = vld [vmem:[#allocation5 + $0x1cc] ss:$16 sps:$4 sm:$0xff]   ;;  %v4546_v4 = vld [vmem:[#allocation7] ss:$8 sps:$4 sm:$0xff]  }
  0xa9   :  { %1219 = vmatprep.subr.bf16.mxu0 %v4962_v14  ;;  %v5038_v14 = vld [vmem:[#allocation2 + $0x48] ss:$12 sps:$4 sm:$0xff]  }
  0xab   :  { %1429 = vmatpush1.bf16.msra.mxu1 %v4455_v34  ;;  %v4551_v34 = vld [vmem:[#allocation7 + $0x14] ss:$8 sps:$4 sm:$0xff]  }
  0xac   :  { %1430 = vmatprep.subr.bf16.mxu1 %v4464_v6  ;;  %1220 = vmatpush1.bf16.msra.mxu0 %v4965_v16  ;;  %v4472_v16 = vld [vmem:[#allocation5 + $0x1c8] ss:$16 sps:$4 sm:$0xff]  }
  0xad   :  { %1073 = vmatmul.mubr.bf16.gmra.mrb[8].mxu0 %v5025_v35  ;;  %1221 = vmatprep.subr.bf16.mxu0 %v4968_v18  ;;  %v4517_v18 = vld [vmem:[#allocation5 + $0x20c] ss:$16 sps:$4 sm:$0xff]   ;;  %v4549_v6 = vld [vmem:[#allocation7 + $0x10] ss:$8 sps:$4 sm:$0xff]  }
  0xae   :  { %1386 = vmatmul.mubr.bf16.gmra.mrb[24].mxu1 %v5028_v8  ;;  %1082 = vmatprep.mubr.bf16.mxu0 %v5031_v10 }
  0xaf   :  { %1431 = vmatpush1.bf16.msra.mxu1 %v4462_v36  ;;  %1395 = vmatprep.mubr.bf16.mxu1 %v4823_v0  ;;  %v4554_v36 = vld [vmem:[#allocation7 + $0x24] ss:$8 sps:$4 sm:$0xff]  }
  0xb0   :  { %1432 = vmatprep.subr.bf16.mxu1 %v4467_v37  ;;  %1222 = vmatpush1.bf16.msra.mxu0 %v4970_v20  ;;  %v4480_v20 = vld [vmem:[#allocation2 + $0x60] ss:$12 sps:$4 sm:$0xff]   ;;  %v4557_v37 = vld [vmem:[#allocation7 + $0x34] ss:$8 sps:$4 sm:$0xff]  }
  0xb1   :  { %1223 = vmatprep.subr.bf16.mxu0 %v4974_v22  ;;  %v4481_v22 = vld [vmem:[#allocation2 + $0x7c] ss:$12 sps:$4 sm:$0xff]  }
  0xb3   :  { %1433 = vmatpush1.bf16.msra.mxu1 %v4465_v38  ;;  %v4555_v38 = vld [vmem:[#allocation7 + $0x30] ss:$8 sps:$4 sm:$0xff]  }
  0xb4   :  { %1434 = vmatprep.subr.bf16.mxu1 %v4474_v12  ;;  %1224 = vmatpush1.bf16.msra.mxu0 %v4977_v24  ;;  %v4484_v24 = vld [vmem:[#allocation2 + $0x94] ss:$12 sps:$4 sm:$0xff]   ;;  %v5077_v12 = vld [vmem:[#allocation2 + $0x98] ss:$12 sps:$4 sm:$0xff]  }
  0xb5   :  { %1083 = vmatmul.mubr.bf16.gmra.mrb[12].mxu0 %v5038_v14  ;;  %1225 = vmatprep.subr.bf16.mxu0 %v4980_v26  ;;  %v4522_v26 = vld [vmem:[#allocation5 + $0x248] ss:$16 sps:$4 sm:$0xff]  }
  0xb6   :  { %1396 = vmatmul.mubr.bf16.gmra.mrb[28].mxu1 %v5041_v39  ;;  %1092 = vmatprep.mubr.bf16.mxu0 %v5044_v40 }
  0xb7   :  { %1435 = vmatpush1.bf16.msra.mxu1 %v4472_v16  ;;  %1438 = vmatprep.mubr.bf16.mxu1 %v4995_v56  ;;  %v4536_v56 = vld [vmem:[#allocation5 + $0x2c8] ss:$16 sps:$4 sm:$0xff]  }
  0xb8   :  { %1436 = vmatprep.subr.bf16.mxu1 %v4477_v41  ;;  %1226 = vmatpush1.bf16.msra.mxu0 %v4983_v28  ;;  %v4525_v28 = vld [vmem:[#allocation5 + $0x268] ss:$16 sps:$4 sm:$0xff]  }
  0xb9   :  { %1227 = vmatprep.subr.bf16.mxu0 %v4986_v30  ;;  %v4487_v30 = vld [vmem:[#allocation2 + $0xac] ss:$12 sps:$4 sm:$0xff]   ;;  %v4558_v16 = vld [vmem:[#allocation7 + $0x40] ss:$8 sps:$4 sm:$0xff]  }
  0xba   :  { %v4561_v41 = vld [vmem:[#allocation7 + $0x50] ss:$8 sps:$4 sm:$0xff]  }
  0xbb   :  { %1437 = vmatpush1.bf16.msra.mxu1 %v4475_v42 }
  0xbc   :  { %1599 = vmatprep.subr.bf16.mxu1 %v4517_v18  ;;  %1228 = vmatpush1.bf16.msra.mxu0 %v4988_v32  ;;  %v4532_v32 = vld [vmem:[#allocation5 + $0x2a8] ss:$16 sps:$4 sm:$0xff]   ;;  %v5084_v18 = vld [vmem:[#allocation2 + $0xb0] ss:$12 sps:$4 sm:$0xff]  }
  0xbd   :  { %1093 = vmatmul.mubr.bf16.gmra.mrb[16].mxu0 %v4480_v20 }
  0xbe   :  { %1439 = vmatmul.mubr.bf16.vlgmr.msra.gmra.mrb[32].mxu1 %v4999_v15  ;;  %1102 = vmatprep.mubr.bf16.mxu0 %v4481_v22  ;;  %v4510_v15 = vld [vmem:[#allocation2 + $0x150] ss:$12 sps:$4 sm:$0xff]  }
  0xbf   :  { %1448 = vmatprep.mubr.bf16.mxu1 %v5005_v23  ;;  %1600 = vmatpush1.bf16.msra.mxu1 %v4515_v43  ;;  %v4514_v23 = vld [vmem:[#allocation2 + $0x8] ss:$12 sps:$4 sm:$0xff]  }
  0xc0   :  { %1601 = vmatprep.subr.bf16.mxu1 %v4520_v44  ;;  %v4564_v44 = vld [vmem:[#allocation7 + $0x60] ss:$8 sps:$4 sm:$0xff]  }
  0xc3   :  { %1602 = vmatpush1.bf16.msra.mxu1 %v4518_v45 }
  0xc4   :  { %1603 = vmatprep.subr.bf16.mxu1 %v4524_v46  ;;  %v4569_v46 = vld [vmem:[#allocation7 + $0x74] ss:$8 sps:$4 sm:$0xff]  }
  0xc5   :  { %1103 = vmatmul.mubr.bf16.gmra.mrb[20].mxu0 %v4483_v47 }
  0xc6   :  { %1449 = vmatmul.mubr.bf16.gmra.mrb[36].mxu1 %v5012_v29  ;;  %1112 = vmatprep.mubr.bf16.mxu0 %v4484_v24  ;;  %v4535_v29 = vld [vmem:[#allocation2 + $0x50] ss:$12 sps:$4 sm:$0xff]  }
  0xc7   :  { %1458 = vmatprep.mubr.bf16.mxu1 %v5017_v33  ;;  %1604 = vmatpush1.bf16.msra.mxu1 %v4522_v26  ;;  %v4548_v33 = vld [vmem:[#allocation7 + $0x4] ss:$8 sps:$4 sm:$0xff]  }
  0xc8   :  { %1605 = vmatprep.subr.bf16.mxu1 %v4527_v48  ;;  %2380 = vmatprep.subr.bf16.mxu0 %v4548_v33  ;;  %v4572_v48 = vld [vmem:[#allocation7 + $0x84] ss:$8 sps:$4 sm:$0xff]   ;;  %v4666_v33 = vld [vmem:[#allocation2 + $0xc8] ss:$12 sps:$4 sm:$0xff]  }
  0xcb   :  { %1606 = vmatpush1.bf16.msra.mxu1 %v4525_v28 }
  0xcc   :  { %1607 = vmatprep.subr.bf16.mxu1 %v4531_v49  ;;  %v4570_v49 = vld [vmem:[#allocation7 + $0x80] ss:$8 sps:$4 sm:$0xff]  }
  0xcd   :  { %1113 = vmatmul.mubr.bf16.gmra.mrb[24].mxu0 %v4486_v50 }
  0xce   :  { %1459 = vmatmul.mubr.bf16.gmra.mrb[40].mxu1 %v5025_v35  ;;  %1122 = vmatprep.mubr.bf16.mxu0 %v4487_v30  ;;  %v5072_v35 = vld [vmem:[#allocation2 + $0x80] ss:$12 sps:$4 sm:$0xff]  }
  0xcf   :  { %1468 = vmatprep.mubr.bf16.mxu1 %v5031_v10  ;;  %1608 = vmatpush1.bf16.msra.mxu1 %v4529_v51  ;;  %v4552_v10 = vld [vmem:[#allocation7 + $0x20] ss:$8 sps:$4 sm:$0xff]   ;;  %v4573_v51 = vld [vmem:[#allocation7 + $0x90] ss:$8 sps:$4 sm:$0xff]  }
  0xd0   :  { %1609 = vmatprep.subr.bf16.mxu1 %v4534_v52 }
  0xd3   :  { %1610 = vmatpush1.bf16.msra.mxu1 %v4532_v32 }
  0xd4   :  { %1611 = vmatprep.subr.bf16.mxu1 %v4538_v53  ;;  %v4578_v53 = vld [vmem:[#allocation7 + $0xa4] ss:$8 sps:$4 sm:$0xff]  }
  0xd5   :  { %1123 = vmatmul.mubr.bf16.gmra.mrb[28].mxu0 %v4489_v54 }
  0xd6   :  { %1469 = vmatmul.mubr.bf16.gmra.mrb[44].mxu1 %v5038_v14  ;;  %1132 = vmatprep.mubr.bf16.mxu0 %v4490_v55  ;;  %v4560_v14 = vld [vmem:[#allocation7 + $0x44] ss:$8 sps:$4 sm:$0xff]  }
  0xd7   :  { %1478 = vmatprep.mubr.bf16.mxu1 %v5044_v40  ;;  %1612 = vmatpush1.bf16.msra.mxu1 %v4536_v56  ;;  %v4563_v40 = vld [vmem:[#allocation7 + $0x54] ss:$8 sps:$4 sm:$0xff]  }
  0xd8   :  { %1613 = vmatprep.subr.bf16.mxu1 %v4541_v57  ;;  %v4581_v57 = vld [vmem:[#allocation7 + $0xb4] ss:$8 sps:$4 sm:$0xff]  }
  0xdb   :  { %1614 = vmatpush1.bf16.msra.mxu1 %v4539_v58  ;;  %v4579_v58 = vld [vmem:[#allocation7 + $0xb0] ss:$8 sps:$4 sm:$0xff]  }
  0xdd   :  { %1133 = vmatmul.mubr.bf16.gmra.mrb[32].mxu0 %v4492_v59 }
  0xde   :  { %1479 = vmatmul.mubr.bf16.gmra.mrb[48].mxu1 %v4480_v20  ;;  %1142 = vmatprep.mubr.bf16.mxu0 %v4493_v60 }
  0xdf   :  { %1488 = vmatprep.mubr.bf16.mxu1 %v4481_v22  ;;  %v4566_v22 = vld [vmem:[#allocation7 + $0x64] ss:$8 sps:$4 sm:$0xff]  }
  0xe5   :  { %1143 = vmatmul.mubr.bf16.gmra.mrb[36].mxu0 %v4495_v61 }
  0xe6   :  { %1489 = vmatmul.mubr.bf16.gmra.mrb[52].mxu1 %v4483_v47  ;;  %1152 = vmatprep.mubr.bf16.mxu0 %v4496_v62  ;;  %v4567_v47 = vld [vmem:[#allocation7 + $0x70] ss:$8 sps:$4 sm:$0xff]  }
  0xe7   :  { %1498 = vmatprep.mubr.bf16.mxu1 %v4484_v24 }
  0xed   :  { %1153 = vmatmul.mubr.bf16.gmra.mrb[40].mxu0 %v4498_v63 }
  0xee   :  { %1499 = vmatmul.mubr.bf16.gmra.mrb[56].mxu1 %v4486_v50  ;;  %1162 = vmatprep.mubr.bf16.mxu0 %v4499_v1 }
  0xef   :  { %1508 = vmatprep.mubr.bf16.mxu1 %v4487_v30  ;;  %v4575_v30 = vld [vmem:[#allocation7 + $0x94] ss:$8 sps:$4 sm:$0xff]  }
  0xf5   :  { %1163 = vmatmul.mubr.bf16.gmra.mrb[44].mxu0 %v4501_v3 }
  0xf6   :  { %1509 = vmatmul.mubr.bf16.gmra.mrb[60].mxu1 %v4489_v54  ;;  %1172 = vmatprep.mubr.bf16.mxu0 %v4502_v5 }
  0xf7   :  { %1518 = vmatprep.mubr.bf16.mxu1 %v4490_v55  ;;  %v4576_v55 = vld [vmem:[#allocation7 + $0xa0] ss:$8 sps:$4 sm:$0xff]  }
  0xfd   :  { %1173 = vmatmul.mubr.bf16.gmra.mrb[48].mxu0 %v4504_v7 }
  0xfe   :  { %1519 = vmatmul.mubr.bf16.gmra.mrb[64].mxu1 %v4492_v59  ;;  %1182 = vmatprep.mubr.bf16.mxu0 %v4505_v9 }
  0xff   :  { %1528 = vmatprep.mubr.bf16.mxu1 %v4493_v60 }
 0x105   :  { %1183 = vmatmul.mubr.bf16.gmra.mrb[52].mxu0 %v4507_v11 }
 0x106   :  { %1529 = vmatmul.mubr.bf16.gmra.mrb[68].mxu1 %v4495_v61  ;;  %1192 = vmatprep.mubr.bf16.mxu0 %v4508_v13  ;;  %v4584_v61 = vld [vmem:[#allocation7 + $0xc4] ss:$8 sps:$4 sm:$0xff]  }
 0x107   :  { %1538 = vmatprep.mubr.bf16.mxu1 %v4496_v62 }
 0x10d   :  { %1193 = vmatmul.mubr.bf16.gmra.mrb[56].mxu0 %v4510_v15 }
 0x10e   :  { %1539 = vmatmul.mubr.bf16.gmra.mrb[72].mxu1 %v4498_v63  ;;  %1202 = vmatprep.mubr.bf16.mxu0 %v4511_v19  ;;  %v4582_v63 = vld [vmem:[#allocation7 + $0xc0] ss:$8 sps:$4 sm:$0xff]  }
 0x10f   :  { %1548 = vmatprep.mubr.bf16.mxu1 %v4499_v1 }
 0x115   :  { %1203 = vmatmul.mubr.bf16.gmra.mrb[60].mxu0 %v4513_v21 }
 0x116   :  { %1549 = vmatmul.mubr.bf16.gmra.mrb[76].mxu1 %v4501_v3  ;;  %1245 = vmatprep.mubr.bf16.mxu0 %v4823_v0  ;;  %v4587_v3 = vld [vmem:[#allocation7 + $0xd4] ss:$8 sps:$4 sm:$0xff]  }
 0x117   :  { %1558 = vmatprep.mubr.bf16.mxu1 %v4502_v5  ;;  %v4585_v5 = vld [vmem:[#allocation7 + $0xd0] ss:$8 sps:$4 sm:$0xff]  }
 0x11d   :  { %1246 = vmatmul.mubr.bf16.vlgmr.msra.gmra.mrb[0].mxu0 %v4514_v23 }
 0x11e   :  { %1559 = vmatmul.mubr.bf16.gmra.mrb[80].mxu1 %v4504_v7  ;;  %1255 = vmatprep.mubr.bf16.mxu0 %v4823_v0 }
 0x11f   :  { %1568 = vmatprep.mubr.bf16.mxu1 %v4505_v9  ;;  %2381 = vmatpush1.bf16.msra.mxu0 %v4546_v4 }
 0x120   :  { %2382 = vmatprep.subr.bf16.mxu0 %v4551_v34  ;;  %v4596_v34 = vld [vmem:[#allocation7 + $0x104] ss:$8 sps:$4 sm:$0xff]  }
 0x123   :  { %2383 = vmatpush1.bf16.msra.mxu0 %v4549_v6 }
 0x124   :  { %2384 = vmatprep.subr.bf16.mxu0 %v4554_v36 }
 0x125   :  { %1256 = vmatmul.mubr.bf16.gmra.mrb[4].mxu0 %v4521_v25 }
 0x126   :  { %1569 = vmatmul.mubr.bf16.gmra.mrb[84].mxu1 %v4507_v11  ;;  %1265 = vmatprep.mubr.bf16.mxu0 %v4823_v0  ;;  %v4590_v11 = vld [vmem:[#allocation7 + $0xe4] ss:$8 sps:$4 sm:$0xff]  }
 0x127   :  { %1578 = vmatprep.mubr.bf16.mxu1 %v4508_v13  ;;  %2385 = vmatpush1.bf16.msra.mxu0 %v4552_v10  ;;  %v4667_v10 = vld [vmem:[#allocation2 + $0xe0] ss:$12 sps:$4 sm:$0xff]  }
 0x128   :  { %2386 = vmatprep.subr.bf16.mxu0 %v4557_v37 }
 0x12b   :  { %2387 = vmatpush1.bf16.msra.mxu0 %v4555_v38 }
 0x12c   :  { %2388 = vmatprep.subr.bf16.mxu0 %v4560_v14 }
 0x12d   :  { %1266 = vmatmul.mubr.bf16.gmra.mrb[8].mxu0 %v4528_v27 }
 0x12e   :  { %1579 = vmatmul.mubr.bf16.gmra.mrb[88].mxu1 %v4510_v15  ;;  %1275 = vmatprep.mubr.bf16.mxu0 %v4823_v0  ;;  %v4588_v15 = vld [vmem:[#allocation7 + $0xe0] ss:$8 sps:$4 sm:$0xff]  }
 0x12f   :  { %1588 = vmatprep.mubr.bf16.mxu1 %v4511_v19  ;;  %2389 = vmatpush1.bf16.msra.mxu0 %v4558_v16  ;;  %v4668_v16 = vld [vmem:[#allocation2 + $0xf8] ss:$12 sps:$4 sm:$0xff]  }
 0x130   :  { %2390 = vmatprep.subr.bf16.mxu0 %v4563_v40  ;;  %v4669_v40 = vld [vmem:[#allocation2 + $0x110] ss:$12 sps:$4 sm:$0xff]  }
 0x133   :  { %2391 = vmatpush1.bf16.msra.mxu0 %v4561_v41  ;;  %v264_v41 = vlaneseq }
 0x134   :  { %2392 = vmatprep.subr.bf16.mxu0 %v4566_v22 }
 0x135   :  { %1276 = vmatmul.mubr.bf16.gmra.mrb[12].mxu0 %v4535_v29 }
 0x136   :  { %1589 = vmatmul.mubr.bf16.gmra.mrb[92].mxu1 %v4513_v21  ;;  %1285 = vmatprep.mubr.bf16.mxu0 %v4823_v0  ;;  %v4593_v21 = vld [vmem:[#allocation7 + $0xf4] ss:$8 sps:$4 sm:$0xff]  }
 0x137   :  { %1631 = vmatprep.mubr.bf16.mxu1 %v4823_v0  ;;  %2393 = vmatpush1.bf16.msra.mxu0 %v4564_v44  ;;  %v5171_v44 = vld [vmem:[%s5653_s2] sm:$0xf] }
 0x138   :  { %2394 = vmatprep.subr.bf16.mxu0 %v4569_v46 }
 0x13b   :  { %2395 = vmatpush1.bf16.msra.mxu0 %v4567_v47 }
 0x13c   :  { %2396 = vmatprep.subr.bf16.mxu0 %v4572_v48 }
 0x13d   :  { %1286 = vmatmul.mubr.bf16.gmra.mrb[16].mxu0 %v4542_v31 }
 0x13e   :  { %1632 = vmatmul.mubr.bf16.vlgmr.msra.gmra.mrb[32].mxu1 %v4514_v23  ;;  %1295 = vmatprep.mubr.bf16.mxu0 %v4823_v0  ;;  %v4591_v23 = vld [vmem:[#allocation7 + $0xf0] ss:$8 sps:$4 sm:$0xff]  }
 0x13f   :  { %1641 = vmatprep.mubr.bf16.mxu1 %v4823_v0  ;;  %2397 = vmatpush1.bf16.msra.mxu0 %v4570_v49 }
 0x140   :  { %2398 = vmatprep.subr.bf16.mxu0 %v4575_v30 }
 0x143   :  { %2399 = vmatpush1.bf16.msra.mxu0 %v4573_v51 }
 0x144   :  { %2400 = vmatprep.subr.bf16.mxu0 %v4578_v53 }
 0x145   :  { %1296 = vmatmul.mubr.bf16.gmra.mrb[20].mxu0 %v5072_v35 }
 0x146   :  { %1642 = vmatmul.mubr.bf16.gmra.mrb[36].mxu1 %v4521_v25  ;;  %1305 = vmatprep.mubr.bf16.mxu0 %v4823_v0 }
 0x147   :  { %1651 = vmatprep.mubr.bf16.mxu1 %v4823_v0  ;;  %2401 = vmatpush1.bf16.msra.mxu0 %v4576_v55 }
 0x148   :  { %2402 = vmatprep.subr.bf16.mxu0 %v4581_v57 }
 0x14b   :  { %2403 = vmatpush1.bf16.msra.mxu0 %v4579_v58 }
 0x14c   :  { %2404 = vmatprep.subr.bf16.mxu0 %v4584_v61 }
 0x14d   :  { %1306 = vmatmul.mubr.bf16.gmra.mrb[24].mxu0 %v5077_v12 }
 0x14e   :  { %1652 = vmatmul.mubr.bf16.gmra.mrb[40].mxu1 %v4528_v27  ;;  %1315 = vmatprep.mubr.bf16.mxu0 %v4823_v0 }
 0x14f   :  { %1661 = vmatprep.mubr.bf16.mxu1 %v4823_v0  ;;  %2405 = vmatpush1.bf16.msra.mxu0 %v4582_v63 }
 0x150   :  { %2406 = vmatprep.subr.bf16.mxu0 %v4587_v3 }
 0x151   :  { %v5082_v42 = vpop.f32.mrb[0].mxu1 }
 0x152   :  { %v5086_v20 = vpop.f32.mrb[1].mxu1 }
 0x153   :  { %v5088_v43 = vpop.f32.mrb[2].mxu1  ;;  %2407 = vmatpush1.bf16.msra.mxu0 %v4585_v5 }
 0x154   :  { %v5090_v45 = vpop.f32.mrb[3].mxu1  ;;  %2408 = vmatprep.subr.bf16.mxu0 %v4590_v11 }
 0x155   :  { %1316 = vmatmul.mubr.bf16.gmra.mrb[28].mxu0 %v5084_v18 }
 0x156   :  { %1662 = vmatmul.mubr.bf16.gmra.mrb[44].mxu1 %v4535_v29 }
 0x157   :  { %1671 = vmatprep.mubr.bf16.mxu1 %v4823_v0  ;;  %2409 = vmatpush1.bf16.msra.mxu0 %v4588_v15 }
 0x158   :  { %2410 = vmatprep.subr.bf16.mxu0 %v4593_v21 }
 0x159   :  { %v5094_v24 = vpop.f32.mrb[4].mxu1 }
 0x15a   :  { %v5096_v26 = vpop.f32.mrb[5].mxu1 }
 0x15b   :  { %v5098_v28 = vpop.f32.mrb[6].mxu1  ;;  %2411 = vmatpush1.bf16.msra.mxu0 %v4591_v23 }
 0x15c   :  { %v5100_v50 = vpop.f32.mrb[7].mxu1  ;;  %2573 = vmatprep.subr.bf16.mxu0 %v4596_v34 }
 0x15e   :  { %1672 = vmatmul.mubr.bf16.gmra.mrb[48].mxu1 %v4542_v31 }
 0x15f   :  { %1681 = vmatprep.mubr.bf16.mxu1 %v4823_v0 }
 0x161   :  { %v5103_v52 = vpop.f32.mrb[8].mxu1 }
 0x162   :  { %v5105_v32 = vpop.f32.mrb[9].mxu1 }
 0x163   :  { %v5107_v54 = vpop.f32.mrb[10].mxu1 }
 0x164   :  { %v5109_v56 = vpop.f32.mrb[11].mxu1 }
 0x166   :  { %1682 = vmatmul.mubr.bf16.gmra.mrb[52].mxu1 %v5072_v35 }
 0x167   :  { %1691 = vmatprep.mubr.bf16.mxu1 %v4823_v0 }
 0x169   :  { %v5113_v59 = vpop.f32.mrb[12].mxu1 }
 0x16a   :  { %v5115_v60 = vpop.f32.mrb[13].mxu1 }
 0x16b   :  { %v5117_v62 = vpop.f32.mrb[14].mxu1 }
 0x16c   :  { %v5119_v1 = vpop.f32.mrb[15].mxu1 }
 0x16e   :  { %1692 = vmatmul.mubr.bf16.gmra.mrb[56].mxu1 %v5077_v12 }
 0x16f   :  { %1701 = vmatprep.mubr.bf16.mxu1 %v4823_v0 }
 0x171   :  { %v5123_v7 = vpop.f32.mrb[16].mxu1 }
 0x172   :  { %v5125_v9 = vpop.f32.mrb[17].mxu1 }
 0x173   :  { %v5127_v13 = vpop.f32.mrb[18].mxu1 }
 0x174   :  { %v5129_v19 = vpop.f32.mrb[19].mxu1 }
 0x176   :  { %1702 = vmatmul.mubr.bf16.gmra.mrb[60].mxu1 %v5084_v18  ;;  %v5164_v18 = vshrl.u32 %v264_v41, 7 }
 0x177   :  { %1711 = vmatprep.mubr.bf16.mxu1 %v4823_v0 }
 0x178   :  { %v266_v22 = vsub.s32 0, %v5164_v18  ;;  %v270_v46 = vsub.s32 1, %v5164_v18 }
 0x179   :  { %v5133_v25 = vpop.f32.mrb[20].mxu1 }
 0x17a   :  { %v5135_v27 = vpop.f32.mrb[21].mxu1 }
 0x17b   :  { %v5137_v29 = vpop.f32.mrb[22].mxu1 }
 0x17c   :  { %v5139_v31 = vpop.f32.mrb[23].mxu1 }
 0x17e   :  { %1712 = vmatmul.mubr.bf16.gmra.mrb[64].mxu1 %v4666_v33 }
 0x17f   :  { %1721 = vmatprep.mubr.bf16.mxu1 %v4823_v0 }
 0x181   :  { %v5142_v4 = vpop.f32.mrb[24].mxu1 }
 0x182   :  { %v5144_v6 = vpop.f32.mrb[25].mxu1 }
 0x183   :  { %v5146_v35 = vpop.f32.mrb[26].mxu1 }
 0x184   :  { %v5148_v36 = vpop.f32.mrb[27].mxu1 }
 0x186   :  { %1722 = vmatmul.mubr.bf16.gmra.mrb[68].mxu1 %v4667_v10 }
 0x187   :  { %1731 = vmatprep.mubr.bf16.mxu1 %v4823_v0 }
 0x189   :  { %v5151_v37 = vpop.f32.mrb[28].mxu1 }
 0x18a   :  { %v5153_v38 = vpop.f32.mrb[29].mxu1 }
 0x18b   :  { %v5155_v12 = vpop.f32.mrb[30].mxu1 }
 0x18c   :  { %v5157_v14 = vpop.f32.mrb[31].mxu1 }
 0x18e   :  { %1732 = vmatmul.mubr.bf16.gmra.mrb[72].mxu1 %v4668_v16 }
 0x18f   :  { %1741 = vmatprep.mubr.bf16.mxu1 %v4823_v0 }
 0x196   :  { %1742 = vmatmul.mubr.bf16.gmra.mrb[76].mxu1 %v4669_v40 }
 0x197   :  { %1751 = vmatprep.mubr.bf16.mxu1 %v4823_v0 }
 0x19e   :  { %1752 = vmatmul.mubr.bf16.gmra.mrb[80].mxu1 %v5002_v17  ;;  %v5178_v17 = vrot.slane %v5171_v44, %v266_v22 }
 0x19f   :  { %1761 = vmatprep.mubr.bf16.mxu1 %v4823_v0 }
 0x1a6   :  { %1762 = vmatmul.mubr.bf16.gmra.mrb[84].mxu1 %v5015_v2  ;;  %v5183_v2 = vrot.slane %v5171_v44, %v270_v46 }
 0x1a7   :  { %1771 = vmatprep.mubr.bf16.mxu1 %v4823_v0 }
 0x1ae   :  { %1772 = vmatmul.mubr.bf16.gmra.mrb[88].mxu1 %v5028_v8 }
 0x1af   :  { %1781 = vmatprep.mubr.bf16.mxu1 %v4823_v0 }
 0x1b0   :  { %v1134_v47 = vpop.f32.mrb[32].mxu0 }
 0x1b1   :  { %v1135_v48 = vadd.f32 %v1134_v47, %v5178_v17  ;;  %v1136_v49 = vpop.f32.mrb[33].mxu0 }
 0x1b2   :  { %v1137_v30 = vadd.f32 %v1136_v49, %v5183_v2  ;;  %v1138_v51 = vpop.f32.mrb[34].mxu0 }
 0x1b3   :  { %v1328_v8 = vadd.f32 %v5082_v42, %v1135_v48  ;;  %v1139_v53 = vadd.f32 %v1138_v51, %v5178_v17  ;;  %v1140_v55 = vpop.f32.mrb[35].mxu0 }
 0x1b4   :  { %v1330_v57 = vadd.f32 %v5086_v20, %v1137_v30  ;;  %v1141_v58 = vadd.f32 %v1140_v55, %v5183_v2 }
 0x1b5   :  { %v1332_v61 = vadd.f32 %v5088_v43, %v1139_v53  ;;  %v1856_v63 = vmax.f32 %v1328_v8, 0.0 }
 0x1b6   :  { %1782 = vmatmul.mubr.bf16.gmra.mrb[92].mxu1 %v5041_v39  ;;  %v1334_v0 = vadd.f32 %v5090_v45, %v1141_v58  ;;  %v1857_v5 = vmax.f32 %v1330_v57, 0.0 }
 0x1b7   :  { %v1860_v3 = vmax.f32 %v1332_v61, 0.0 }
 0x1b8   :  { %v1861_v11 = vmax.f32 %v1334_v0, 0.0  ;;  %v1144_v15 = vpop.f32.mrb[36].mxu0 }
 0x1b9   :  { %v1145_v42 = vadd.f32 %v1144_v15, %v5178_v17  ;;  %v1146_v21 = vpop.f32.mrb[37].mxu0  ;;  %v5196_v23 = vpack.c.bf16 %v1860_v3, %v1856_v63 }
 0x1ba   :  { %v1147_v20 = vadd.f32 %v1146_v21, %v5183_v2  ;;  %v1148_v33 = vpop.f32.mrb[38].mxu0  ;;  %v5199_v34 = vpack.c.bf16 %v1861_v11, %v1857_v5 }
 0x1bb   :  { %v1338_v43 = vadd.f32 %v5094_v24, %v1145_v42  ;;  %v1149_v39 = vadd.f32 %v1148_v33, %v5178_v17  ;;  %v1150_v45 = vpop.f32.mrb[39].mxu0 }
 0x1bc   :  { %v1340_v10 = vadd.f32 %v5096_v26, %v1147_v20  ;;  %v1151_v16 = vadd.f32 %v1150_v45, %v5183_v2 }
 0x1bd   :  { %v1342_v40 = vadd.f32 %v5098_v28, %v1149_v39  ;;  %v1864_v47 = vmax.f32 %v1338_v43, 0.0 }
 0x1be   :  { %v1344_v41 = vadd.f32 %v5100_v50, %v1151_v16  ;;  %v1865_v49 = vmax.f32 %v1340_v10, 0.0 }
 0x1bf   :  { %v1868_v48 = vmax.f32 %v1342_v40, 0.0 }
 0x1c0   :  { %v1869_v30 = vmax.f32 %v1344_v41, 0.0  ;;  %v1154_v51 = vpop.f32.mrb[40].mxu0 }
 0x1c1   :  { %v1155_v8 = vadd.f32 %v1154_v51, %v5178_v17  ;;  %v1156_v53 = vpop.f32.mrb[41].mxu0  ;;  %v5208_v24 = vpack.c.bf16 %v1868_v48, %v1864_v47 }
 0x1c2   :  { %v1157_v55 = vadd.f32 %v1156_v53, %v5183_v2  ;;  %v1158_v57 = vpop.f32.mrb[42].mxu0  ;;  %v5211_v26 = vpack.c.bf16 %v1869_v30, %v1865_v49 }
 0x1c3   :  { %v1348_v58 = vadd.f32 %v5103_v52, %v1155_v8  ;;  %v1159_v28 = vadd.f32 %v1158_v57, %v5178_v17  ;;  %v1160_v50 = vpop.f32.mrb[43].mxu0 }
 0x1c4   :  { %v1350_v61 = vadd.f32 %v5105_v32, %v1157_v55  ;;  %v1161_v0 = vadd.f32 %v1160_v50, %v5183_v2 }
 0x1c5   :  { %v1352_v63 = vadd.f32 %v5107_v54, %v1159_v28  ;;  %v1872_v5 = vmax.f32 %v1348_v58, 0.0 }
 0x1c6   :  { %v1354_v3 = vadd.f32 %v5109_v56, %v1161_v0  ;;  %v1873_v15 = vmax.f32 %v1350_v61, 0.0 }
 0x1c7   :  { %v1876_v11 = vmax.f32 %v1352_v63, 0.0 }
 0x1c8   :  { %v1877_v42 = vmax.f32 %v1354_v3, 0.0  ;;  %v1164_v21 = vpop.f32.mrb[44].mxu0 }
 0x1c9   :  { %v1165_v20 = vadd.f32 %v1164_v21, %v5178_v17  ;;  %v1166_v33 = vpop.f32.mrb[45].mxu0  ;;  %v5220_v52 = vpack.c.bf16 %v1876_v11, %v1872_v5 }
 0x1ca   :  { %v1167_v43 = vadd.f32 %v1166_v33, %v5183_v2  ;;  %v1168_v39 = vpop.f32.mrb[46].mxu0  ;;  %v5223_v32 = vpack.c.bf16 %v1877_v42, %v1873_v15 }
 0x1cb   :  { %v1358_v45 = vadd.f32 %v5113_v59, %v1165_v20  ;;  %v1169_v54 = vadd.f32 %v1168_v39, %v5178_v17  ;;  %v1170_v56 = vpop.f32.mrb[47].mxu0 }
 0x1cc   :  { %v1360_v10 = vadd.f32 %v5115_v60, %v1167_v43  ;;  %v1171_v16 = vadd.f32 %v1170_v56, %v5183_v2 }
 0x1cd   :  { %v1362_v40 = vadd.f32 %v5117_v62, %v1169_v54  ;;  %v1880_v47 = vmax.f32 %v1358_v45, 0.0 }
 0x1ce   :  { %v1364_v41 = vadd.f32 %v5119_v1, %v1171_v16  ;;  %v1881_v49 = vmax.f32 %v1360_v10, 0.0 }
 0x1cf   :  { %v1884_v48 = vmax.f32 %v1362_v40, 0.0 }
 0x1d0   :  { %v1885_v30 = vmax.f32 %v1364_v41, 0.0  ;;  %v1174_v51 = vpop.f32.mrb[48].mxu0 }
 0x1d1   :  { %v1175_v8 = vadd.f32 %v1174_v51, %v5178_v17  ;;  %v1176_v53 = vpop.f32.mrb[49].mxu0  ;;  %v5232_v59 = vpack.c.bf16 %v1884_v48, %v1880_v47 }
 0x1d2   :  { %v1177_v55 = vadd.f32 %v1176_v53, %v5183_v2  ;;  %v1178_v57 = vpop.f32.mrb[50].mxu0  ;;  %v5235_v60 = vpack.c.bf16 %v1885_v30, %v1881_v49 }
 0x1d3   :  { %v1368_v58 = vadd.f32 %v5123_v7, %v1175_v8  ;;  %v1179_v62 = vadd.f32 %v1178_v57, %v5178_v17  ;;  %v1180_v1 = vpop.f32.mrb[51].mxu0 }
 0x1d4   :  { %v1370_v28 = vadd.f32 %v5125_v9, %v1177_v55  ;;  %v1181_v50 = vadd.f32 %v1180_v1, %v5183_v2 }
 0x1d5   :  { %v1372_v61 = vadd.f32 %v5127_v13, %v1179_v62  ;;  %v1888_v63 = vmax.f32 %v1368_v58, 0.0 }
 0x1d6   :  { %v1374_v0 = vadd.f32 %v5129_v19, %v1181_v50  ;;  %v1889_v5 = vmax.f32 %v1370_v28, 0.0 }
 0x1d7   :  { %v1892_v3 = vmax.f32 %v1372_v61, 0.0 }
 0x1d8   :  { %v1893_v11 = vmax.f32 %v1374_v0, 0.0  ;;  %v1184_v15 = vpop.f32.mrb[52].mxu0 }
 0x1d9   :  { %v1185_v42 = vadd.f32 %v1184_v15, %v5178_v17  ;;  %v1186_v21 = vpop.f32.mrb[53].mxu0  ;;  %v5244_v7 = vpack.c.bf16 %v1892_v3, %v1888_v63 }
 0x1da   :  { %v1187_v20 = vadd.f32 %v1186_v21, %v5183_v2  ;;  %v1188_v33 = vpop.f32.mrb[54].mxu0  ;;  %v5247_v9 = vpack.c.bf16 %v1893_v11, %v1889_v5 }
 0x1db   :  { %v1378_v43 = vadd.f32 %v5133_v25, %v1185_v42  ;;  %v1189_v13 = vadd.f32 %v1188_v33, %v5178_v17  ;;  %v1190_v19 = vpop.f32.mrb[55].mxu0 }
 0x1dc   :  { %v1380_v39 = vadd.f32 %v5135_v27, %v1187_v20  ;;  %v1191_v45 = vadd.f32 %v1190_v19, %v5183_v2 }
 0x1dd   :  { %v1382_v54 = vadd.f32 %v5137_v29, %v1189_v13  ;;  %v1896_v10 = vmax.f32 %v1378_v43, 0.0 }
 0x1de   :  { %v1384_v56 = vadd.f32 %v5139_v31, %v1191_v45  ;;  %v1897_v40 = vmax.f32 %v1380_v39, 0.0 }
 0x1df   :  { %v1900_v16 = vmax.f32 %v1382_v54, 0.0 }
 0x1e0   :  { %v1901_v41 = vmax.f32 %v1384_v56, 0.0  ;;  %v1194_v47 = vpop.f32.mrb[56].mxu0 }
 0x1e1   :  { %v1195_v48 = vadd.f32 %v1194_v47, %v5178_v17  ;;  %v1196_v49 = vpop.f32.mrb[57].mxu0  ;;  %v5256_v25 = vpack.c.bf16 %v1900_v16, %v1896_v10 }
 0x1e2   :  { %v1197_v30 = vadd.f32 %v1196_v49, %v5183_v2  ;;  %v1198_v51 = vpop.f32.mrb[58].mxu0  ;;  %v5259_v27 = vpack.c.bf16 %v1901_v41, %v1897_v40 }
 0x1e3   :  { %v1388_v8 = vadd.f32 %v5142_v4, %v1195_v48  ;;  %v1199_v29 = vadd.f32 %v1198_v51, %v5178_v17  ;;  %v1200_v31 = vpop.f32.mrb[59].mxu0 }
 0x1e4   :  { %v1390_v53 = vadd.f32 %v5144_v6, %v1197_v30  ;;  %v1201_v55 = vadd.f32 %v1200_v31, %v5183_v2 }
 0x1e5   :  { %v1392_v57 = vadd.f32 %v5146_v35, %v1199_v29  ;;  %v1904_v62 = vmax.f32 %v1388_v8, 0.0  ;;  %v4594_v8 = vld [vmem:[#allocation7 + $0x100] ss:$8 sps:$4 sm:$0xff]  }
 0x1e6   :  { %v1394_v58 = vadd.f32 %v5148_v36, %v1201_v55  ;;  %v1905_v28 = vmax.f32 %v1390_v53, 0.0  ;;  %v4599_v53 = vld [vmem:[#allocation7 + $0x114] ss:$8 sps:$4 sm:$0xff]  }
 0x1e7   :  { %v1908_v1 = vmax.f32 %v1392_v57, 0.0 }
 0x1e8   :  { %v1909_v50 = vmax.f32 %v1394_v58, 0.0  ;;  %v1204_v61 = vpop.f32.mrb[60].mxu0 }
 0x1e9   :  { %v1205_v0 = vadd.f32 %v1204_v61, %v5178_v17  ;;  %v1206_v63 = vpop.f32.mrb[61].mxu0  ;;  %v5268_v4 = vpack.c.bf16 %v1908_v1, %v1904_v62 }
 0x1ea   :  { %v1207_v3 = vadd.f32 %v1206_v63, %v5183_v2  ;;  %v1208_v5 = vpop.f32.mrb[62].mxu0  ;;  %v5271_v6 = vpack.c.bf16 %v1909_v50, %v1905_v28  ;;  %v4597_v28 = vld [vmem:[#allocation7 + $0x110] ss:$8 sps:$4 sm:$0xff]  }
 0x1eb   :  { %v1398_v11 = vadd.f32 %v5151_v37, %v1205_v0  ;;  %v1209_v35 = vadd.f32 %v1208_v5, %v5178_v17  ;;  %v1210_v36 = vpop.f32.mrb[63].mxu0  ;;  %v4602_v0 = vld [vmem:[#allocation7 + $0x124] ss:$8 sps:$4 sm:$0xff]  }
 0x1ec   :  { %v1400_v15 = vadd.f32 %v5153_v38, %v1207_v3  ;;  %v1211_v42 = vadd.f32 %v1210_v36, %v5183_v2  ;;  %v4600_v36 = vld [vmem:[#allocation7 + $0x120] ss:$8 sps:$4 sm:$0xff]  }
 0x1ed   :  { %v1402_v21 = vadd.f32 %v5155_v12, %v1209_v35  ;;  %v1912_v33 = vmax.f32 %v1398_v11, 0.0 }
 0x1ee   :  { %v1404_v20 = vadd.f32 %v5157_v14, %v1211_v42  ;;  %v1913_v13 = vmax.f32 %v1400_v15, 0.0 }
 0x1ef   :  { %v1916_v43 = vmax.f32 %v1402_v21, 0.0  ;;  %v4605_v21 = vld [vmem:[#allocation7 + $0x134] ss:$8 sps:$4 sm:$0xff]  }
 0x1f0   :  { %v1917_v19 = vmax.f32 %v1404_v20, 0.0  ;;  %v1247_v39 = vpop.f32.mrb[0].mxu0 }
 0x1f1   :  { %v3939_v45 = vadd.f32 %v1247_v39, %v5178_v17  ;;  %v1249_v54 = vpop.f32.mrb[1].mxu0  ;;  %v5280_v37 = vpack.c.bf16 %v1916_v43, %v1912_v33  ;;  %v4603_v39 = vld [vmem:[#allocation7 + $0x130] ss:$8 sps:$4 sm:$0xff]  }
 0x1f2   :  { %v3940_v56 = vadd.f32 %v1249_v54, %v5183_v2  ;;  %v1251_v10 = vpop.f32.mrb[2].mxu0  ;;  %v5283_v38 = vpack.c.bf16 %v1917_v19, %v1913_v13 }
 0x1f3   :  { %v3941_v16 = vadd.f32 %v1251_v10, %v5178_v17  ;;  %v1253_v12 = vpop.f32.mrb[3].mxu0  ;;  %v1792_v40 = vmax.f32 %v3939_v45, 0.0 }
 0x1f4   :  { %v3942_v14 = vadd.f32 %v1253_v12, %v5183_v2  ;;  %v1793_v47 = vmax.f32 %v3940_v56, 0.0  ;;  %v4608_v56 = vld [vmem:[#allocation7 + $0x144] ss:$8 sps:$4 sm:$0xff]  }
 0x1f5   :  { %v1796_v41 = vmax.f32 %v3941_v16, 0.0 }
 0x1f6   :  { %v1797_v48 = vmax.f32 %v3942_v14, 0.0 }
 0x1f7   :  { %v1920_v49 = vpack.c.bf16 %v1796_v41, %v1792_v40  ;;  %v4606_v41 = vld [vmem:[#allocation7 + $0x140] ss:$8 sps:$4 sm:$0xff]  }
 0x1f8   :  { %v1921_v30 = vpack.c.bf16 %v1797_v48, %v1793_v47  ;;  %v1257_v51 = vpop.f32.mrb[4].mxu0 }
 0x1f9   :  { %v3943_v29 = vadd.f32 %v1257_v51, %v5178_v17  ;;  %v1259_v31 = vpop.f32.mrb[5].mxu0 }
 0x1fa   :  { %v3944_v55 = vadd.f32 %v1259_v31, %v5183_v2  ;;  %v1261_v57 = vpop.f32.mrb[6].mxu0  ;;  %2412 = vmatprep.mubr.bf16.mxu0 %v1921_v30  ;;  %v4611_v30 = vld [vmem:[#allocation7 + $0x154] ss:$8 sps:$4 sm:$0xff]  }
 0x1fb   :  { %v3945_v58 = vadd.f32 %v1261_v57, %v5178_v17  ;;  %v1263_v62 = vpop.f32.mrb[7].mxu0  ;;  %2413 = vmatmul.mubr.bf16.vlgmr.msra.gmra.mrb[64].mxu0 %v1920_v49  ;;  %v1800_v50 = vmax.f32 %v3943_v29, 0.0  ;;  %v274_v49 = vsub.s32 2, %v5164_v18  ;;  %v278_v29 = vsub.s32 3, %v5164_v18  ;;  %v4609_v57 = vld [vmem:[#allocation7 + $0x150] ss:$8 sps:$4 sm:$0xff]  }
 0x1fc   :  { %v3946_v1 = vadd.f32 %v1263_v62, %v5183_v2  ;;  %2574 = vmatpush1.bf16.msra.mxu0 %v4594_v8  ;;  %v1801_v63 = vmax.f32 %v3944_v55, 0.0 }
 0x1fd   :  { %v1804_v61 = vmax.f32 %v3945_v58, 0.0  ;;  %2575 = vmatprep.subr.bf16.mxu0 %v4599_v53 }
 0x1fe   :  { %v1805_v3 = vmax.f32 %v3946_v1, 0.0  ;;  %v5302_v1 = vrot.slane %v5171_v44, %v274_v49 }
 0x1ff   :  { %v1924_v5 = vpack.c.bf16 %v1804_v61, %v1800_v50 }
 0x200   :  { %v1925_v11 = vpack.c.bf16 %v1805_v3, %v1801_v63  ;;  %v1267_v35 = vpop.f32.mrb[8].mxu0  ;;  %2576 = vmatpush1.bf16.msra.mxu0 %v4597_v28  ;;  %v4614_v28 = vld [vmem:[#allocation7 + $0x164] ss:$8 sps:$4 sm:$0xff]  }
 0x201   :  { %v3947_v15 = vadd.f32 %v1267_v35, %v5178_v17  ;;  %v1269_v42 = vpop.f32.mrb[9].mxu0  ;;  %2577 = vmatprep.subr.bf16.mxu0 %v4602_v0  ;;  %v5305_v0 = vrot.slane %v5171_v44, %v278_v29  ;;  %v4612_v35 = vld [vmem:[#allocation7 + $0x160] ss:$8 sps:$4 sm:$0xff]  }
 0x202   :  { %v3948_v20 = vadd.f32 %v1269_v42, %v5183_v2  ;;  %v1271_v33 = vpop.f32.mrb[10].mxu0  ;;  %2422 = vmatprep.mubr.bf16.mxu0 %v1925_v11 }
 0x203   :  { %v3949_v43 = vadd.f32 %v1271_v33, %v5178_v17  ;;  %v1273_v13 = vpop.f32.mrb[11].mxu0  ;;  %2423 = vmatmul.mubr.bf16.gmra.mrb[68].mxu0 %v1924_v5  ;;  %v1808_v45 = vmax.f32 %v3947_v15, 0.0 }
 0x204   :  { %v3950_v19 = vadd.f32 %v1273_v13, %v5183_v2  ;;  %2578 = vmatpush1.bf16.msra.mxu0 %v4600_v36  ;;  %v1809_v10 = vmax.f32 %v3948_v20, 0.0  ;;  %v4617_v20 = vld [vmem:[#allocation7 + $0x174] ss:$8 sps:$4 sm:$0xff]  }
 0x205   :  { %v1812_v54 = vmax.f32 %v3949_v43, 0.0  ;;  %2579 = vmatprep.subr.bf16.mxu0 %v4605_v21 }
 0x206   :  { %v1813_v16 = vmax.f32 %v3950_v19, 0.0 }
 0x207   :  { %v1928_v12 = vpack.c.bf16 %v1812_v54, %v1808_v45 }
 0x208   :  { %v1929_v14 = vpack.c.bf16 %v1813_v16, %v1809_v10  ;;  %v1277_v40 = vpop.f32.mrb[12].mxu0  ;;  %2580 = vmatpush1.bf16.msra.mxu0 %v4603_v39  ;;  %v4615_v16 = vld [vmem:[#allocation7 + $0x170] ss:$8 sps:$4 sm:$0xff]  }
 0x209   :  { %v3951_v47 = vadd.f32 %v1277_v40, %v5178_v17  ;;  %v1279_v48 = vpop.f32.mrb[13].mxu0  ;;  %2581 = vmatprep.subr.bf16.mxu0 %v4608_v56 }
 0x20a   :  { %v3952_v51 = vadd.f32 %v1279_v48, %v5183_v2  ;;  %v1281_v8 = vpop.f32.mrb[14].mxu0  ;;  %2432 = vmatprep.mubr.bf16.mxu0 %v1929_v14 }
 0x20b   :  { %v3953_v31 = vadd.f32 %v1281_v8, %v5178_v17  ;;  %v1283_v53 = vpop.f32.mrb[15].mxu0  ;;  %2433 = vmatmul.mubr.bf16.gmra.mrb[72].mxu0 %v1928_v12  ;;  %v1816_v58 = vmax.f32 %v3951_v47, 0.0  ;;  %v4620_v47 = vld [vmem:[#allocation7 + $0x184] ss:$8 sps:$4 sm:$0xff]  }
 0x20c   :  { %v3954_v55 = vadd.f32 %v1283_v53, %v5183_v2  ;;  %2582 = vmatpush1.bf16.msra.mxu0 %v4606_v41  ;;  %v1817_v50 = vmax.f32 %v3952_v51, 0.0 }
 0x20d   :  { %v1820_v62 = vmax.f32 %v3953_v31, 0.0  ;;  %2583 = vmatprep.subr.bf16.mxu0 %v4611_v30 }
 0x20e   :  { %v1821_v61 = vmax.f32 %v3954_v55, 0.0 }
 0x20f   :  { %v1932_v63 = vpack.c.bf16 %v1820_v62, %v1816_v58  ;;  %v4618_v58 = vld [vmem:[#allocation7 + $0x180] ss:$8 sps:$4 sm:$0xff]  }
 0x210   :  { %v1933_v3 = vpack.c.bf16 %v1821_v61, %v1817_v50  ;;  %v1287_v5 = vpop.f32.mrb[16].mxu0  ;;  %2584 = vmatpush1.bf16.msra.mxu0 %v4609_v57 }
 0x211   :  { %v1633_v11 = vpop.f32.mrb[32].mxu1  ;;  %v3955_v36 = vadd.f32 %v1287_v5, %v5178_v17  ;;  %v1289_v42 = vpop.f32.mrb[17].mxu0  ;;  %2585 = vmatprep.subr.bf16.mxu0 %v4614_v28 }
 0x212   :  { %v4035_v15 = vadd.f32 %v1633_v11, %v5302_v1  ;;  %v1635_v21 = vpop.f32.mrb[33].mxu1  ;;  %v3956_v33 = vadd.f32 %v1289_v42, %v5183_v2  ;;  %v1291_v44 = vpop.f32.mrb[18].mxu0  ;;  %2442 = vmatprep.mubr.bf16.mxu0 %v1933_v3 }
 0x213   :  { %v4036_v43 = vadd.f32 %v1635_v21, %v5305_v0  ;;  %v1637_v13 = vpop.f32.mrb[34].mxu1  ;;  %v3957_v19 = vadd.f32 %v1291_v44, %v5178_v17  ;;  %v1293_v45 = vpop.f32.mrb[19].mxu0  ;;  %2443 = vmatmul.mubr.bf16.gmra.mrb[76].mxu0 %v1932_v63  ;;  %v1824_v12 = vmax.f32 %v3955_v36, 0.0  ;;  %v4623_v63 = vld [vmem:[#allocation7 + $0x194] ss:$8 sps:$4 sm:$0xff]  }
 0x214   :  { %v4037_v39 = vadd.f32 %v1637_v13, %v5302_v1  ;;  %v1639_v54 = vpop.f32.mrb[35].mxu1  ;;  %v3958_v56 = vadd.f32 %v1293_v45, %v5183_v2  ;;  %2586 = vmatpush1.bf16.msra.mxu0 %v4612_v35  ;;  %v1794_v14 = vmax.f32 %v4035_v15, 0.0  ;;  %v1825_v48 = vmax.f32 %v3956_v33, 0.0  ;;  %v4626_v45 = vld [vmem:[#allocation7 + $0x1a4] ss:$8 sps:$4 sm:$0xff]  }
 0x215   :  { %v4038_v10 = vadd.f32 %v1639_v54, %v5305_v0  ;;  %v1828_v40 = vmax.f32 %v3957_v19, 0.0  ;;  %2587 = vmatprep.subr.bf16.mxu0 %v4617_v20  ;;  %v1795_v49 = vmax.f32 %v4036_v43, 0.0  ;;  %v4621_v43 = vld [vmem:[#allocation7 + $0x190] ss:$8 sps:$4 sm:$0xff]  }
 0x216   :  { %v1798_v41 = vmax.f32 %v4037_v39, 0.0  ;;  %v1829_v30 = vmax.f32 %v3958_v56, 0.0 }
 0x217   :  { %v1799_v51 = vmax.f32 %v4038_v10, 0.0  ;;  %v1936_v8 = vpack.c.bf16 %v1828_v40, %v1824_v12 }
 0x218   :  { %v5315_v29 = vpack.c.bf16 %v1798_v41, %v1794_v14  ;;  %v1937_v31 = vpack.c.bf16 %v1829_v30, %v1825_v48  ;;  %v1297_v55 = vpop.f32.mrb[20].mxu0  ;;  %2588 = vmatpush1.bf16.msra.mxu0 %v4615_v16 }
 0x219   :  { %v5317_v53 = vpack.c.bf16 %v1799_v51, %v1795_v49  ;;  %v1643_v57 = vpop.f32.mrb[36].mxu1  ;;  %v3959_v62 = vadd.f32 %v1297_v55, %v5178_v17  ;;  %v1299_v50 = vpop.f32.mrb[21].mxu0  ;;  %2589 = vmatprep.subr.bf16.mxu0 %v4620_v47  ;;  %v4624_v49 = vld [vmem:[#allocation7 + $0x1a0] ss:$8 sps:$4 sm:$0xff]   ;;  %v4629_v55 = vld [vmem:[#allocation7 + $0x1b4] ss:$8 sps:$4 sm:$0xff]  }
 0x21a   :  { %v4039_v28 = vadd.f32 %v1643_v57, %v5302_v1  ;;  %v1645_v61 = vpop.f32.mrb[37].mxu1  ;;  %v3960_v3 = vadd.f32 %v1299_v50, %v5183_v2  ;;  %v1301_v11 = vpop.f32.mrb[22].mxu0  ;;  %2452 = vmatprep.mubr.bf16.mxu0 %v1937_v31 }
 0x21b   :  { %v4040_v5 = vadd.f32 %v1645_v61, %v5305_v0  ;;  %v1647_v35 = vpop.f32.mrb[38].mxu1  ;;  %v3961_v36 = vadd.f32 %v1301_v11, %v5178_v17  ;;  %v1303_v42 = vpop.f32.mrb[23].mxu0  ;;  %2453 = vmatmul.mubr.bf16.gmra.mrb[80].mxu0 %v1936_v8  ;;  %v1832_v44 = vmax.f32 %v3959_v62, 0.0 }
 0x21c   :  { %v4041_v15 = vadd.f32 %v1647_v35, %v5302_v1  ;;  %v1649_v21 = vpop.f32.mrb[39].mxu1  ;;  %v3962_v20 = vadd.f32 %v1303_v42, %v5183_v2  ;;  %2590 = vmatpush1.bf16.msra.mxu0 %v4618_v58  ;;  %v1802_v13 = vmax.f32 %v4039_v28, 0.0  ;;  %v1833_v54 = vmax.f32 %v3960_v3, 0.0  ;;  %v4627_v35 = vld [vmem:[#allocation7 + $0x1b0] ss:$8 sps:$4 sm:$0xff]  }
 0x21d   :  { %v4042_v33 = vadd.f32 %v1649_v21, %v5305_v0  ;;  %v1836_v19 = vmax.f32 %v3961_v36, 0.0  ;;  %2591 = vmatprep.subr.bf16.mxu0 %v4623_v63  ;;  %v1803_v56 = vmax.f32 %v4040_v5, 0.0 }
 0x21e   :  { %v1806_v39 = vmax.f32 %v4041_v15, 0.0  ;;  %v1837_v10 = vmax.f32 %v3962_v20, 0.0  ;;  %v4632_v20 = vld [vmem:[#allocation7 + $0x1c4] ss:$8 sps:$4 sm:$0xff]  }
 0x21f   :  { %v1807_v16 = vmax.f32 %v4042_v33, 0.0  ;;  %v1940_v12 = vpack.c.bf16 %v1836_v19, %v1832_v44 }
 0x220   :  { %v5327_v14 = vpack.c.bf16 %v1806_v39, %v1802_v13  ;;  %v1941_v40 = vpack.c.bf16 %v1837_v10, %v1833_v54  ;;  %v1307_v47 = vpop.f32.mrb[24].mxu0  ;;  %2592 = vmatpush1.bf16.msra.mxu0 %v4621_v43 }
 0x221   :  { %v5329_v41 = vpack.c.bf16 %v1807_v16, %v1803_v56  ;;  %v1653_v48 = vpop.f32.mrb[40].mxu1  ;;  %v3963_v30 = vadd.f32 %v1307_v47, %v5178_v17  ;;  %v1309_v8 = vpop.f32.mrb[25].mxu0  ;;  %2593 = vmatprep.subr.bf16.mxu0 %v4626_v45  ;;  %v4630_v16 = vld [vmem:[#allocation7 + $0x1c0] ss:$8 sps:$4 sm:$0xff]  }
 0x222   :  { %v4043_v51 = vadd.f32 %v1653_v48, %v5302_v1  ;;  %v1655_v31 = vpop.f32.mrb[41].mxu1  ;;  %v3964_v57 = vadd.f32 %v1309_v8, %v5183_v2  ;;  %v1311_v62 = vpop.f32.mrb[26].mxu0  ;;  %2462 = vmatprep.mubr.bf16.mxu0 %v1941_v40 }
 0x223   :  { %v4044_v58 = vadd.f32 %v1655_v31, %v5305_v0  ;;  %v1657_v28 = vpop.f32.mrb[42].mxu1  ;;  %v3965_v50 = vadd.f32 %v1311_v62, %v5178_v17  ;;  %v1313_v63 = vpop.f32.mrb[27].mxu0  ;;  %2463 = vmatmul.mubr.bf16.gmra.mrb[84].mxu0 %v1940_v12  ;;  %v1840_v36 = vmax.f32 %v3963_v30, 0.0 }
 0x224   :  { %v4045_v61 = vadd.f32 %v1657_v28, %v5302_v1  ;;  %v1659_v3 = vpop.f32.mrb[43].mxu1  ;;  %v3966_v5 = vadd.f32 %v1313_v63, %v5183_v2  ;;  %2594 = vmatpush1.bf16.msra.mxu0 %v4624_v49  ;;  %v1810_v15 = vmax.f32 %v4043_v51, 0.0  ;;  %v1841_v33 = vmax.f32 %v3964_v57, 0.0  ;;  %v4635_v49 = vld [vmem:[#allocation7 + $0x1d4] ss:$8 sps:$4 sm:$0xff]  }
 0x225   :  { %v4046_v11 = vadd.f32 %v1659_v3, %v5305_v0  ;;  %v1844_v42 = vmax.f32 %v3965_v50, 0.0  ;;  %2595 = vmatprep.subr.bf16.mxu0 %v4629_v55  ;;  %v1811_v43 = vmax.f32 %v4044_v58, 0.0 }
 0x226   :  { %v1814_v21 = vmax.f32 %v4045_v61, 0.0  ;;  %v1845_v44 = vmax.f32 %v3966_v5, 0.0  ;;  %v4633_v61 = vld [vmem:[#allocation7 + $0x1d0] ss:$8 sps:$4 sm:$0xff]  }
 0x227   :  { %v1815_v13 = vmax.f32 %v4046_v11, 0.0  ;;  %v1944_v19 = vpack.c.bf16 %v1844_v42, %v1840_v36 }
 0x228   :  { %v5339_v39 = vpack.c.bf16 %v1814_v21, %v1810_v15  ;;  %v1945_v45 = vpack.c.bf16 %v1845_v44, %v1841_v33  ;;  %v1317_v56 = vpop.f32.mrb[28].mxu0  ;;  %2596 = vmatpush1.bf16.msra.mxu0 %v4627_v35  ;;  %v4638_v35 = vld [vmem:[#allocation7 + $0x1e4] ss:$8 sps:$4 sm:$0xff]   ;;  %v4636_v44 = vld [vmem:[#allocation7 + $0x1e0] ss:$8 sps:$4 sm:$0xff]  }
 0x229   :  { %v5341_v54 = vpack.c.bf16 %v1815_v13, %v1811_v43  ;;  %v1663_v10 = vpop.f32.mrb[44].mxu1  ;;  %v3967_v12 = vadd.f32 %v1317_v56, %v5178_v17  ;;  %v1319_v47 = vpop.f32.mrb[29].mxu0  ;;  %2597 = vmatprep.subr.bf16.mxu0 %v4632_v20 }
 0x22a   :  { %v4047_v40 = vadd.f32 %v1663_v10, %v5302_v1  ;;  %v1665_v48 = vpop.f32.mrb[45].mxu1  ;;  %v3968_v30 = vadd.f32 %v1319_v47, %v5183_v2  ;;  %v1321_v8 = vpop.f32.mrb[30].mxu0  ;;  %2472 = vmatprep.mubr.bf16.mxu0 %v1945_v45  ;;  %v4641_v45 = vld [vmem:[#allocation7 + $0x1f4] ss:$8 sps:$4 sm:$0xff]   ;;  %v4639_v47 = vld [vmem:[#allocation7 + $0x1f0] ss:$8 sps:$4 sm:$0xff]  }
 0x22b   :  { %v4048_v51 = vadd.f32 %v1665_v48, %v5305_v0  ;;  %v1667_v31 = vpop.f32.mrb[46].mxu1  ;;  %v3969_v55 = vadd.f32 %v1321_v8, %v5178_v17  ;;  %v1323_v58 = vpop.f32.mrb[31].mxu0  ;;  %2473 = vmatmul.mubr.bf16.gmra.mrb[88].mxu0 %v1944_v19  ;;  %v1848_v63 = vmax.f32 %v3967_v12, 0.0 }
 0x22c   :  { %v4049_v57 = vadd.f32 %v1667_v31, %v5302_v1  ;;  %v1669_v62 = vpop.f32.mrb[47].mxu1  ;;  %v3970_v28 = vadd.f32 %v1323_v58, %v5183_v2  ;;  %2598 = vmatpush1.bf16.msra.mxu0 %v4630_v16  ;;  %v1818_v3 = vmax.f32 %v4047_v40, 0.0  ;;  %v1849_v36 = vmax.f32 %v3968_v30, 0.0 }
 0x22d   :  { %v4050_v50 = vadd.f32 %v1669_v62, %v5305_v0  ;;  %v1852_v5 = vmax.f32 %v3969_v55, 0.0  ;;  %2599 = vmatprep.subr.bf16.mxu0 %v4635_v49  ;;  %v1819_v15 = vmax.f32 %v4048_v51, 0.0 }
 0x22e   :  { %v1822_v11 = vmax.f32 %v4049_v57, 0.0  ;;  %v1853_v17 = vmax.f32 %v3970_v28, 0.0 }
 0x22f   :  { %v1823_v42 = vmax.f32 %v4050_v50, 0.0  ;;  %v1948_v21 = vpack.c.bf16 %v1852_v5, %v1848_v63 }
 0x230   :  { %v5351_v20 = vpack.c.bf16 %v1822_v11, %v1818_v3  ;;  %v1949_v33 = vpack.c.bf16 %v1853_v17, %v1849_v36  ;;  %2600 = vmatpush1.bf16.msra.mxu0 %v4633_v61 }
 0x231   :  { %v5353_v43 = vpack.c.bf16 %v1823_v42, %v1819_v15  ;;  %v1673_v2 = vpop.f32.mrb[48].mxu1  ;;  %2601 = vmatprep.subr.bf16.mxu0 %v4638_v35 }
 0x232   :  { %v4051_v13 = vadd.f32 %v1673_v2, %v5302_v1  ;;  %v1675_v19 = vpop.f32.mrb[49].mxu1  ;;  %2482 = vmatprep.mubr.bf16.mxu0 %v1949_v33 }
 0x233   :  { %v4052_v56 = vadd.f32 %v1675_v19, %v5305_v0  ;;  %v1677_v10 = vpop.f32.mrb[50].mxu1  ;;  %2483 = vmatmul.mubr.bf16.gmra.mrb[92].mxu0 %v1948_v21 }
 0x234   :  { %v4053_v16 = vadd.f32 %v1677_v10, %v5302_v1  ;;  %v1679_v12 = vpop.f32.mrb[51].mxu1  ;;  %2492 = vmatprep.mubr.bf16.mxu0 %v5199_v34  ;;  %2602 = vmatpush1.bf16.msra.mxu0 %v4636_v44  ;;  %v1826_v48 = vmax.f32 %v4051_v13, 0.0 }
 0x235   :  { %v4054_v40 = vadd.f32 %v1679_v12, %v5305_v0  ;;  %2603 = vmatprep.subr.bf16.mxu0 %v4641_v45  ;;  %v1827_v30 = vmax.f32 %v4052_v56, 0.0 }
 0x236   :  { %v1830_v49 = vmax.f32 %v4053_v16, 0.0 }
 0x237   :  { %v1831_v51 = vmax.f32 %v4054_v40, 0.0 }
 0x238   :  { %v5360_v8 = vpack.c.bf16 %v1830_v49, %v1826_v48  ;;  %2604 = vmatpush1.bf16.msra.mxu0 %v4639_v47 }
 0x239   :  { %v5362_v31 = vpack.c.bf16 %v1831_v51, %v1827_v30  ;;  %v1683_v55 = vpop.f32.mrb[52].mxu1 }
 0x23a   :  { %v4055_v57 = vadd.f32 %v1683_v55, %v5302_v1  ;;  %v1685_v58 = vpop.f32.mrb[53].mxu1 }
 0x23b   :  { %v4056_v62 = vadd.f32 %v1685_v58, %v5305_v0  ;;  %v1687_v28 = vpop.f32.mrb[54].mxu1  ;;  %2493 = vmatmul.mubr.bf16.gmra.mrb[96].mxu0 %v5196_v23 }
 0x23c   :  { %v4057_v34 = vadd.f32 %v1687_v28, %v5302_v1  ;;  %v1689_v50 = vpop.f32.mrb[55].mxu1  ;;  %2502 = vmatprep.mubr.bf16.mxu0 %v5211_v26  ;;  %v1834_v63 = vmax.f32 %v4055_v57, 0.0 }
 0x23d   :  { %v4058_v61 = vadd.f32 %v1689_v50, %v5305_v0  ;;  %v1835_v5 = vmax.f32 %v4056_v62, 0.0 }
 0x23e   :  { %v1838_v3 = vmax.f32 %v4057_v34, 0.0 }
 0x23f   :  { %v1839_v11 = vmax.f32 %v4058_v61, 0.0 }
 0x240   :  { %v5370_v35 = vpack.c.bf16 %v1838_v3, %v1834_v63 }
 0x241   :  { %v5372_v36 = vpack.c.bf16 %v1839_v11, %v1835_v5  ;;  %v1693_v15 = vpop.f32.mrb[56].mxu1 }
 0x242   :  { %v4059_v17 = vadd.f32 %v1693_v15, %v5302_v1  ;;  %v1695_v42 = vpop.f32.mrb[57].mxu1 }
 0x243   :  { %v4060_v21 = vadd.f32 %v1695_v42, %v5305_v0  ;;  %v1697_v33 = vpop.f32.mrb[58].mxu1  ;;  %2503 = vmatmul.mubr.bf16.gmra.mrb[100].mxu0 %v5208_v24 }
 0x244   :  { %v4061_v23 = vadd.f32 %v1697_v33, %v5302_v1  ;;  %v1699_v2 = vpop.f32.mrb[59].mxu1  ;;  %2512 = vmatprep.mubr.bf16.mxu0 %v5223_v32  ;;  %v1842_v44 = vmax.f32 %v4059_v17, 0.0 }
 0x245   :  { %v4062_v26 = vadd.f32 %v1699_v2, %v5305_v0  ;;  %v1843_v19 = vmax.f32 %v4060_v21, 0.0 }
 0x246   :  { %v1846_v13 = vmax.f32 %v4061_v23, 0.0 }
 0x247   :  { %v1847_v45 = vmax.f32 %v4062_v26, 0.0 }
 0x248   :  { %v5380_v56 = vpack.c.bf16 %v1846_v13, %v1842_v44 }
 0x249   :  { %v5382_v10 = vpack.c.bf16 %v1847_v45, %v1843_v19  ;;  %v1703_v16 = vpop.f32.mrb[60].mxu1 }
 0x24a   :  { %v4063_v12 = vadd.f32 %v1703_v16, %v5302_v1  ;;  %v1705_v40 = vpop.f32.mrb[61].mxu1 }
 0x24b   :  { %v4064_v47 = vadd.f32 %v1705_v40, %v5305_v0  ;;  %v1707_v48 = vpop.f32.mrb[62].mxu1  ;;  %2513 = vmatmul.mubr.bf16.gmra.mrb[104].mxu0 %v5220_v52 }
 0x24c   :  { %v4065_v24 = vadd.f32 %v1707_v48, %v5302_v1  ;;  %v1709_v49 = vpop.f32.mrb[63].mxu1  ;;  %2522 = vmatprep.mubr.bf16.mxu0 %v5235_v60  ;;  %v1850_v30 = vmax.f32 %v4063_v12, 0.0 }
 0x24d   :  { %v4066_v32 = vadd.f32 %v1709_v49, %v5305_v0  ;;  %v1851_v55 = vmax.f32 %v4064_v47, 0.0 }
 0x24e   :  { %v1854_v51 = vmax.f32 %v4065_v24, 0.0 }
 0x24f   :  { %v1855_v57 = vmax.f32 %v4066_v32, 0.0 }
 0x250   :  { %v5390_v58 = vpack.c.bf16 %v1854_v51, %v1850_v30 }
 0x251   :  { %v5392_v62 = vpack.c.bf16 %v1855_v57, %v1851_v55  ;;  %v1713_v28 = vpop.f32.mrb[64].mxu1  ;;  %v4642_v55 = vld [vmem:[#allocation8 + $0x40] sm:$0xff]  }
 0x252   :  { %v4067_v34 = vadd.f32 %v1713_v28, %v5302_v1  ;;  %v1715_v50 = vpop.f32.mrb[65].mxu1  ;;  %3923 = vmatprep.subr.bf16.mxu1 %v4642_v55  ;;  %3723 = vmatprep.subr.bf16.mxu0 %v4642_v55 }
 0x253   :  { %v4068_v61 = vadd.f32 %v1715_v50, %v5305_v0  ;;  %v1717_v63 = vpop.f32.mrb[66].mxu1  ;;  %2523 = vmatmul.mubr.bf16.gmra.mrb[108].mxu0 %v5232_v59 }
 0x254   :  { %v4069_v52 = vadd.f32 %v1717_v63, %v5302_v1  ;;  %v1719_v3 = vpop.f32.mrb[67].mxu1  ;;  %2532 = vmatprep.mubr.bf16.mxu0 %v5247_v9  ;;  %v1858_v5 = vmax.f32 %v4067_v34, 0.0  ;;  %v4643_v34 = vld [vmem:[#allocation8] sm:$0xff]  }
 0x255   :  { %v4070_v60 = vadd.f32 %v1719_v3, %v5305_v0  ;;  %v1859_v15 = vmax.f32 %v4068_v61, 0.0  ;;  %3931 = vmatpush3.bf16.msra.mxu1 %v4643_v34 }
 0x256   :  { %v1862_v11 = vmax.f32 %v4069_v52, 0.0 }
 0x257   :  { %v1863_v17 = vmax.f32 %v4070_v60, 0.0 }
 0x258   :  { %v5400_v42 = vpack.c.bf16 %v1862_v11, %v1858_v5 }
 0x259   :  { %v5402_v21 = vpack.c.bf16 %v1863_v17, %v1859_v15  ;;  %v1723_v33 = vpop.f32.mrb[68].mxu1 }
 0x25a   :  { %v4071_v23 = vadd.f32 %v1723_v33, %v5302_v1  ;;  %v1725_v2 = vpop.f32.mrb[69].mxu1 }
 0x25b   :  { %v4072_v26 = vadd.f32 %v1725_v2, %v5305_v0  ;;  %v1727_v44 = vpop.f32.mrb[70].mxu1  ;;  %2533 = vmatmul.mubr.bf16.gmra.mrb[112].mxu0 %v5244_v7 }
 0x25c   :  { %v4073_v59 = vadd.f32 %v1727_v44, %v5302_v1  ;;  %v1729_v13 = vpop.f32.mrb[71].mxu1  ;;  %2542 = vmatprep.mubr.bf16.mxu0 %v5259_v27  ;;  %v1866_v19 = vmax.f32 %v4071_v23, 0.0 }
 0x25d   :  { %v4074_v9 = vadd.f32 %v1729_v13, %v5305_v0  ;;  %v1867_v16 = vmax.f32 %v4072_v26, 0.0 }
 0x25e   :  { %v1870_v45 = vmax.f32 %v4073_v59, 0.0 }
 0x25f   :  { %v1871_v12 = vmax.f32 %v4074_v9, 0.0 }
 0x260   :  { %v5410_v40 = vpack.c.bf16 %v1870_v45, %v1866_v19 }
 0x261   :  { %v5412_v47 = vpack.c.bf16 %v1871_v12, %v1867_v16  ;;  %v1733_v48 = vpop.f32.mrb[72].mxu1 }
 0x262   :  { %v4075_v24 = vadd.f32 %v1733_v48, %v5302_v1  ;;  %v1735_v49 = vpop.f32.mrb[73].mxu1 }
 0x263   :  { %v4076_v32 = vadd.f32 %v1735_v49, %v5305_v0  ;;  %v1737_v30 = vpop.f32.mrb[74].mxu1  ;;  %2543 = vmatmul.mubr.bf16.gmra.mrb[116].mxu0 %v5256_v25 }
 0x264   :  { %v4077_v7 = vadd.f32 %v1737_v30, %v5302_v1  ;;  %v1739_v51 = vpop.f32.mrb[75].mxu1  ;;  %2552 = vmatprep.mubr.bf16.mxu0 %v5271_v6  ;;  %v1874_v57 = vmax.f32 %v4075_v24, 0.0  ;;  %v4645_v24 = vld [vmem:[#allocation8 + $0x8] sm:$0xff]   ;;  %v4646_v30 = vld [vmem:[#allocation8 + $0x50] sm:$0xff]  }
 0x265   :  { %v4078_v27 = vadd.f32 %v1739_v51, %v5305_v0  ;;  %v1875_v50 = vmax.f32 %v4076_v32, 0.0 }
 0x266   :  { %v1878_v28 = vmax.f32 %v4077_v7, 0.0 }
 0x267   :  { %v1879_v61 = vmax.f32 %v4078_v27, 0.0 }
 0x268   :  { %v5420_v63 = vpack.c.bf16 %v1878_v28, %v1874_v57 }
 0x269   :  { %v5422_v52 = vpack.c.bf16 %v1879_v61, %v1875_v50  ;;  %v1743_v3 = vpop.f32.mrb[76].mxu1  ;;  %v4648_v61 = vld [vmem:[#allocation8 + $0x58] sm:$0xff]  }
 0x26a   :  { %v4079_v25 = vadd.f32 %v1743_v3, %v5302_v1  ;;  %v1745_v60 = vpop.f32.mrb[77].mxu1 }
 0x26b   :  { %v4080_v5 = vadd.f32 %v1745_v60, %v5305_v0  ;;  %v1747_v6 = vpop.f32.mrb[78].mxu1  ;;  %2553 = vmatmul.mubr.bf16.gmra.mrb[120].mxu0 %v5268_v4 }
 0x26c   :  { %v4081_v11 = vadd.f32 %v1747_v6, %v5302_v1  ;;  %v1749_v15 = vpop.f32.mrb[79].mxu1  ;;  %2562 = vmatprep.mubr.bf16.mxu0 %v5283_v38  ;;  %v1882_v33 = vmax.f32 %v4079_v25, 0.0  ;;  %v4644_v38 = vld [vmem:[#allocation8 + $0x48] sm:$0xff]   ;;  %v4649_v6 = vld [vmem:[#allocation8 + $0x18] sm:$0xff]  }
 0x26d   :  { %v4082_v17 = vadd.f32 %v1749_v15, %v5305_v0  ;;  %v1883_v2 = vmax.f32 %v4080_v5, 0.0  ;;  %3924 = vmatprep.subr.bf16.mxu1 %v4644_v38 }
 0x26e   :  { %v1886_v23 = vmax.f32 %v4081_v11, 0.0  ;;  %3932 = vmatpush3.bf16.msra.mxu1 %v4645_v24 }
 0x26f   :  { %v1887_v26 = vmax.f32 %v4082_v17, 0.0  ;;  %3925 = vmatprep.subr.bf16.mxu1 %v4646_v30  ;;  %v4650_v17 = vld [vmem:[#allocation8 + $0x60] sm:$0xff]  }
 0x270   :  { %v5430_v44 = vpack.c.bf16 %v1886_v23, %v1882_v33 }
 0x271   :  { %v5432_v59 = vpack.c.bf16 %v1887_v26, %v1883_v2  ;;  %v1753_v13 = vpop.f32.mrb[80].mxu1 }
 0x272   :  { %v4083_v9 = vadd.f32 %v1753_v13, %v5302_v1  ;;  %v1755_v19 = vpop.f32.mrb[81].mxu1  ;;  %v4651_v13 = vld [vmem:[#allocation8 + $0x20] sm:$0xff]  }
 0x273   :  { %v4084_v45 = vadd.f32 %v1755_v19, %v5305_v0  ;;  %v1757_v16 = vpop.f32.mrb[82].mxu1  ;;  %2563 = vmatmul.mubr.bf16.gmra.mrb[124].mxu0 %v5280_v37  ;;  %v4647_v37 = vld [vmem:[#allocation8 + $0x10] sm:$0xff]  }
 0x274   :  { %v4085_v4 = vadd.f32 %v1757_v16, %v5302_v1  ;;  %v1759_v12 = vpop.f32.mrb[83].mxu1  ;;  %2605 = vmatprep.mubr.bf16.mxu0 %v5317_v53  ;;  %v1890_v49 = vmax.f32 %v4083_v9, 0.0  ;;  %3933 = vmatpush3.bf16.msra.mxu1 %v4647_v37 }
 0x275   :  { %v4086_v48 = vadd.f32 %v1759_v12, %v5305_v0  ;;  %v1891_v7 = vmax.f32 %v4084_v45, 0.0  ;;  %3926 = vmatprep.subr.bf16.mxu1 %v4648_v61 }
 0x276   :  { %v1894_v32 = vmax.f32 %v4085_v4, 0.0 }
 0x277   :  { %v1895_v51 = vmax.f32 %v4086_v48, 0.0 }
 0x278   :  { %v5440_v27 = vpack.c.bf16 %v1894_v32, %v1890_v49  ;;  %3934 = vmatpush3.bf16.msra.mxu1 %v4649_v6  ;;  %v4654_v49 = vld [vmem:[#allocation8 + $0x70] sm:$0xff]  }
 0x279   :  { %v5442_v55 = vpack.c.bf16 %v1895_v51, %v1891_v7  ;;  %v1763_v57 = vpop.f32.mrb[84].mxu1  ;;  %3927 = vmatprep.subr.bf16.mxu1 %v4650_v17 }
 0x27a   :  { %v4087_v28 = vadd.f32 %v1763_v57, %v5302_v1  ;;  %v1765_v50 = vpop.f32.mrb[85].mxu1 }
 0x27b   :  { %v4088_v53 = vadd.f32 %v1765_v50, %v5305_v0  ;;  %v1767_v3 = vpop.f32.mrb[86].mxu1  ;;  %2606 = vmatmul.mubr.bf16.vlgmr.msra.gmra.mrb[64].mxu0 %v5315_v29 }
 0x27c   :  { %v4089_v25 = vadd.f32 %v1767_v3, %v5302_v1  ;;  %v1769_v60 = vpop.f32.mrb[87].mxu1  ;;  %2615 = vmatprep.mubr.bf16.mxu0 %v5329_v41  ;;  %3724 = vmatpush3.bf16.msra.mxu0 %v4643_v34  ;;  %v1898_v11 = vmax.f32 %v4087_v28, 0.0  ;;  %v4652_v34 = vld [vmem:[#allocation8 + $0x68] sm:$0xff]  }
 0x27d   :  { %v4090_v5 = vadd.f32 %v1769_v60, %v5305_v0  ;;  %3725 = vmatprep.subr.bf16.mxu0 %v4644_v38  ;;  %v1899_v33 = vmax.f32 %v4088_v53, 0.0  ;;  %3935 = vmatpush3.bf16.msra.mxu1 %v4651_v13  ;;  %v4653_v38 = vld [vmem:[#allocation8 + $0x28] sm:$0xff]  }
 0x27e   :  { %v1902_v15 = vmax.f32 %v4089_v25, 0.0  ;;  %3928 = vmatprep.subr.bf16.mxu1 %v4652_v34 }
 0x27f   :  { %v1903_v23 = vmax.f32 %v4090_v5, 0.0 }
 0x280   :  { %v5450_v2 = vpack.c.bf16 %v1902_v15, %v1898_v11  ;;  %3726 = vmatpush3.bf16.msra.mxu0 %v4645_v24 }
 0x281   :  { %v5452_v26 = vpack.c.bf16 %v1903_v23, %v1899_v33  ;;  %v1773_v29 = vpop.f32.mrb[88].mxu1  ;;  %3727 = vmatprep.subr.bf16.mxu0 %v4646_v30  ;;  %3936 = vmatpush3.bf16.msra.mxu1 %v4653_v38 }
 0x282   :  { %v4091_v9 = vadd.f32 %v1773_v29, %v5302_v1  ;;  %v1775_v41 = vpop.f32.mrb[89].mxu1  ;;  %3929 = vmatprep.subr.bf16.mxu1 %v4654_v49 }
 0x283   :  { %v4092_v19 = vadd.f32 %v1775_v41, %v5305_v0  ;;  %v1777_v45 = vpop.f32.mrb[90].mxu1  ;;  %2616 = vmatmul.mubr.bf16.gmra.mrb[68].mxu0 %v5327_v14  ;;  %v4655_v14 = vld [vmem:[#allocation8 + $0x30] sm:$0xff]  }
 0x284   :  { %v4093_v16 = vadd.f32 %v1777_v45, %v5302_v1  ;;  %v1779_v4 = vpop.f32.mrb[91].mxu1  ;;  %2625 = vmatprep.mubr.bf16.mxu0 %v5341_v54  ;;  %3728 = vmatpush3.bf16.msra.mxu0 %v4647_v37  ;;  %v1906_v48 = vmax.f32 %v4091_v9, 0.0 }
 0x285   :  { %v4094_v12 = vadd.f32 %v1779_v4, %v5305_v0  ;;  %3729 = vmatprep.subr.bf16.mxu0 %v4648_v61  ;;  %v1907_v32 = vmax.f32 %v4092_v19, 0.0  ;;  %3937 = vmatpush3.bf16.msra.mxu1 %v4655_v14 }
 0x286   :  { %v1910_v24 = vmax.f32 %v4093_v16, 0.0 }
 0x287   :  { %v1911_v30 = vmax.f32 %v4094_v12, 0.0 }
 0x288   :  { %v1978_v7 = vpack.c.bf16 %v1910_v24, %v1906_v48  ;;  %3730 = vmatpush3.bf16.msra.mxu0 %v4649_v6 }
 0x289   :  { %v1979_v51 = vpack.c.bf16 %v1911_v30, %v1907_v32  ;;  %v1783_v57 = vpop.f32.mrb[92].mxu1  ;;  %3731 = vmatprep.subr.bf16.mxu0 %v4650_v17 }
 0x28a   :  { %v4095_v28 = vadd.f32 %v1783_v57, %v5302_v1  ;;  %v1785_v50 = vpop.f32.mrb[93].mxu1 }
 0x28b   :  { %v4096_v54 = vadd.f32 %v1785_v50, %v5305_v0  ;;  %v1787_v37 = vpop.f32.mrb[94].mxu1  ;;  %2626 = vmatmul.mubr.bf16.gmra.mrb[72].mxu0 %v5339_v39  ;;  %v2048_v39 = vld [vmem:[%s5655_s4] sm:$0x3] }
 0x28c   :  { %v4097_v61 = vadd.f32 %v1787_v37, %v5302_v1  ;;  %v1789_v53 = vpop.f32.mrb[95].mxu1  ;;  %2635 = vmatprep.mubr.bf16.mxu0 %v5353_v43  ;;  %3732 = vmatpush3.bf16.msra.mxu0 %v4651_v13  ;;  %v1914_v25 = vmax.f32 %v4095_v28, 0.0  ;;  %v4656_v1 = vld [vmem:[#allocation8 + $0x78] sm:$0xff]   ;;  %v5496_v43 = vrot.slane %v2048_v39, %v270_v46  ;;  %v4659_v28 = vld [vmem:[#allocation10 + $0x8] sm:$0xff]  }
 0x28d   :  { %v4098_v3 = vadd.f32 %v1789_v53, %v5305_v0  ;;  %3733 = vmatprep.subr.bf16.mxu0 %v4652_v34  ;;  %v1915_v5 = vmax.f32 %v4096_v54, 0.0  ;;  %v4657_v0 = vld [vmem:[#allocation8 + $0x38] sm:$0xff]   ;;  %3930 = vmatprep.subr.bf16.mxu1 %v4656_v1 }
 0x28e   :  { %v1918_v60 = vmax.f32 %v4097_v61, 0.0  ;;  %3938 = vmatpush3.bf16.msra.mxu1 %v4657_v0 }
 0x28f   :  { %v1919_v6 = vmax.f32 %v4098_v3, 0.0 }
 0x290   :  { %v1982_v11 = vpack.c.bf16 %v1918_v60, %v1914_v25  ;;  %3734 = vmatpush3.bf16.msra.mxu0 %v4653_v38  ;;  %v4660_v60 = vld [vmem:[#allocation10 + $0x10] sm:$0xff]  }
 0x291   :  { %v1983_v15 = vpack.c.bf16 %v1919_v6, %v1915_v5  ;;  %3735 = vmatprep.subr.bf16.mxu0 %v4654_v49 }
 0x293   :  { %2636 = vmatmul.mubr.bf16.gmra.mrb[76].mxu0 %v5351_v20  ;;  %v5492_v20 = vrot.slane %v2048_v39, %v266_v22 }
 0x294   :  { %2645 = vmatprep.mubr.bf16.mxu0 %v5362_v31  ;;  %3736 = vmatpush3.bf16.msra.mxu0 %v4655_v14 }
 0x295   :  { %3737 = vmatprep.subr.bf16.mxu0 %v4656_v1 }
 0x298   :  { %3738 = vmatpush3.bf16.msra.mxu0 %v4657_v0 }
 0x29b   :  { %2646 = vmatmul.mubr.bf16.gmra.mrb[80].mxu0 %v5360_v8 }
 0x29c   :  { %2655 = vmatprep.mubr.bf16.mxu0 %v5372_v36 }
 0x2a3   :  { %2656 = vmatmul.mubr.bf16.gmra.mrb[84].mxu0 %v5370_v35 }
 0x2a4   :  { %2665 = vmatprep.mubr.bf16.mxu0 %v5382_v10 }
 0x2ab   :  { %2666 = vmatmul.mubr.bf16.gmra.mrb[88].mxu0 %v5380_v56 }
 0x2ac   :  { %2675 = vmatprep.mubr.bf16.mxu0 %v5392_v62  ;;  %v4658_v62 = vld [vmem:[#allocation10] sm:$0xff]  }
 0x2ad   :  { %3859 = vmatprep.subr.bf16.mxu1 %v4658_v62 }
 0x2b3   :  { %2676 = vmatmul.mubr.bf16.gmra.mrb[92].mxu0 %v5390_v58 }
 0x2b4   :  { %2685 = vmatprep.mubr.bf16.mxu0 %v5402_v21 }
 0x2bb   :  { %2686 = vmatmul.mubr.bf16.gmra.mrb[96].mxu0 %v5400_v42 }
 0x2bc   :  { %2695 = vmatprep.mubr.bf16.mxu0 %v5412_v47 }
 0x2c3   :  { %2696 = vmatmul.mubr.bf16.gmra.mrb[100].mxu0 %v5410_v40 }
 0x2c4   :  { %2705 = vmatprep.mubr.bf16.mxu0 %v5422_v52 }
 0x2cb   :  { %2706 = vmatmul.mubr.bf16.gmra.mrb[104].mxu0 %v5420_v63 }
 0x2cc   :  { %2715 = vmatprep.mubr.bf16.mxu0 %v5432_v59 }
 0x2d3   :  { %2716 = vmatmul.mubr.bf16.gmra.mrb[108].mxu0 %v5430_v44 }
 0x2d4   :  { %2725 = vmatprep.mubr.bf16.mxu0 %v5442_v55 }
 0x2db   :  { %2726 = vmatmul.mubr.bf16.gmra.mrb[112].mxu0 %v5440_v27 }
 0x2dc   :  { %2735 = vmatprep.mubr.bf16.mxu0 %v5452_v26 }
 0x2e3   :  { %2736 = vmatmul.mubr.bf16.gmra.mrb[116].mxu0 %v5450_v2 }
 0x2e4   :  { %2745 = vmatprep.mubr.bf16.mxu0 %v1979_v51 }
 0x2eb   :  { %2746 = vmatmul.mubr.bf16.gmra.mrb[120].mxu0 %v1978_v7 }
 0x2ec   :  { %2755 = vmatprep.mubr.bf16.mxu0 %v1983_v15 }
 0x2f3   :  { %2756 = vmatmul.mubr.bf16.gmra.mrb[124].mxu0 %v1982_v11 }
 0x34e   :  { %v2607_v8 = vpop.f32.mrb[64].mxu0 }
 0x34f   :  { %v4099_v31 = vadd.f32 %v2607_v8, %v5492_v20  ;;  %v2609_v35 = vpop.f32.mrb[65].mxu0 }
 0x350   :  { %v4100_v36 = vadd.f32 %v2609_v35, %v5496_v43  ;;  %v2611_v56 = vpop.f32.mrb[66].mxu0 }
 0x351   :  { %v4101_v10 = vadd.f32 %v2611_v56, %v5492_v20  ;;  %v2613_v58 = vpop.f32.mrb[67].mxu0  ;;  %v2766_v21 = vmax.f32 %v4099_v31, 0.0 }
 0x352   :  { %v4102_v42 = vadd.f32 %v2613_v58, %v5496_v43  ;;  %v2767_v40 = vmax.f32 %v4100_v36, 0.0 }
 0x353   :  { %v2768_v22 = vmax.f32 %v4101_v10, 0.0 }
 0x354   :  { %v2769_v18 = vmax.f32 %v4102_v42, 0.0 }
 0x355   :  { %v2830_v46 = vpack.c.bf16 %v2768_v22, %v2766_v21 }
 0x356   :  { %v2831_v47 = vpack.c.bf16 %v2769_v18, %v2767_v40  ;;  %v2617_v63 = vpop.f32.mrb[68].mxu0 }
 0x357   :  { %v4103_v52 = vadd.f32 %v2617_v63, %v5492_v20  ;;  %v2619_v44 = vpop.f32.mrb[69].mxu0 }
 0x358   :  { %v4104_v59 = vadd.f32 %v2619_v44, %v5496_v43  ;;  %v2621_v27 = vpop.f32.mrb[70].mxu0  ;;  %3029 = vmatprep.mubr.bf16.mxu0 %v2831_v47 }
 0x359   :  { %v4105_v55 = vadd.f32 %v2621_v27, %v5492_v20  ;;  %v2623_v17 = vpop.f32.mrb[71].mxu0  ;;  %3030 = vmatmul.mubr.bf16.vlgmr.msra.gmra.mrb[128].mxu0 %v2830_v46  ;;  %v2770_v23 = vmax.f32 %v4103_v52, 0.0 }
 0x35a   :  { %v4106_v33 = vadd.f32 %v2623_v17, %v5496_v43  ;;  %v2771_v26 = vmax.f32 %v4104_v59, 0.0 }
 0x35b   :  { %v2772_v2 = vmax.f32 %v4105_v55, 0.0 }
 0x35c   :  { %v2773_v29 = vmax.f32 %v4106_v33, 0.0 }
 0x35d   :  { %v2832_v13 = vpack.c.bf16 %v2772_v2, %v2770_v23 }
 0x35e   :  { %v2833_v9 = vpack.c.bf16 %v2773_v29, %v2771_v26  ;;  %v2627_v41 = vpop.f32.mrb[72].mxu0 }
 0x35f   :  { %v4107_v34 = vadd.f32 %v2627_v41, %v5492_v20  ;;  %v2629_v19 = vpop.f32.mrb[73].mxu0 }
 0x360   :  { %v4108_v45 = vadd.f32 %v2629_v19, %v5496_v43  ;;  %v2631_v16 = vpop.f32.mrb[74].mxu0  ;;  %3037 = vmatprep.mubr.bf16.mxu0 %v2833_v9 }
 0x361   :  { %v4109_v4 = vadd.f32 %v2631_v16, %v5492_v20  ;;  %v2633_v12 = vpop.f32.mrb[75].mxu0  ;;  %3038 = vmatmul.mubr.bf16.gmra.mrb[132].mxu0 %v2832_v13  ;;  %v2774_v48 = vmax.f32 %v4107_v34, 0.0 }
 0x362   :  { %v4110_v38 = vadd.f32 %v2633_v12, %v5496_v43  ;;  %v2775_v49 = vmax.f32 %v4108_v45, 0.0 }
 0x363   :  { %v2776_v24 = vmax.f32 %v4109_v4, 0.0 }
 0x364   :  { %v2777_v32 = vmax.f32 %v4110_v38, 0.0 }
 0x365   :  { %v2834_v30 = vpack.c.bf16 %v2776_v24, %v2774_v48 }
 0x366   :  { %v2835_v7 = vpack.c.bf16 %v2777_v32, %v2775_v49  ;;  %v2637_v51 = vpop.f32.mrb[76].mxu0 }
 0x367   :  { %v4111_v57 = vadd.f32 %v2637_v51, %v5492_v20  ;;  %v2639_v14 = vpop.f32.mrb[77].mxu0 }
 0x368   :  { %v4112_v50 = vadd.f32 %v2639_v14, %v5496_v43  ;;  %v2641_v54 = vpop.f32.mrb[78].mxu0  ;;  %3045 = vmatprep.mubr.bf16.mxu1 %v2835_v7 }
 0x369   :  { %v4113_v37 = vadd.f32 %v2641_v54, %v5492_v20  ;;  %v2643_v61 = vpop.f32.mrb[79].mxu0  ;;  %3046 = vmatmul.mubr.bf16.vlgmr.msra.gmra.mrb[96].mxu1 %v2834_v30  ;;  %v2778_v3 = vmax.f32 %v4111_v57, 0.0 }
 0x36a   :  { %v4114_v53 = vadd.f32 %v2643_v61, %v5496_v43  ;;  %3860 = vmatpush3.bf16.msra.mxu1 %v4658_v62  ;;  %v2779_v5 = vmax.f32 %v4112_v50, 0.0 }
 0x36b   :  { %v2780_v25 = vmax.f32 %v4113_v37, 0.0  ;;  %3861 = vmatprep.subr.bf16.mxu1 %v4659_v28 }
 0x36c   :  { %v2781_v6 = vmax.f32 %v4114_v53, 0.0 }
 0x36d   :  { %v2836_v11 = vpack.c.bf16 %v2780_v25, %v2778_v3 }
 0x36e   :  { %v2837_v15 = vpack.c.bf16 %v2781_v6, %v2779_v5  ;;  %v2647_v1 = vpop.f32.mrb[80].mxu0  ;;  %3862 = vmatpush3.bf16.msra.mxu1 %v4659_v28 }
 0x36f   :  { %v4115_v0 = vadd.f32 %v2647_v1, %v5492_v20  ;;  %v2649_v39 = vpop.f32.mrb[81].mxu0  ;;  %3863 = vmatprep.subr.bf16.mxu1 %v4660_v60 }
 0x370   :  { %v4116_v8 = vadd.f32 %v2649_v39, %v5496_v43  ;;  %v2651_v31 = vpop.f32.mrb[82].mxu0  ;;  %3053 = vmatprep.mubr.bf16.mxu1 %v2837_v15 }
 0x371   :  { %v4117_v35 = vadd.f32 %v2651_v31, %v5492_v20  ;;  %v2653_v36 = vpop.f32.mrb[83].mxu0  ;;  %3054 = vmatmul.mubr.bf16.gmra.mrb[100].mxu1 %v2836_v11  ;;  %v2782_v10 = vmax.f32 %v4115_v0, 0.0 }
 0x372   :  { %v4118_v56 = vadd.f32 %v2653_v36, %v5496_v43  ;;  %3864 = vmatpush3.bf16.msra.mxu1 %v4660_v60  ;;  %v2783_v62 = vmax.f32 %v4116_v8, 0.0 }
 0x373   :  { %v2784_v58 = vmax.f32 %v4117_v35, 0.0 }
 0x374   :  { %v2785_v42 = vmax.f32 %v4118_v56, 0.0 }
 0x375   :  { %v2838_v21 = vpack.c.bf16 %v2784_v58, %v2782_v10 }
 0x376   :  { %v2839_v22 = vpack.c.bf16 %v2785_v42, %v2783_v62  ;;  %v2657_v40 = vpop.f32.mrb[84].mxu0 }
 0x377   :  { %v4119_v18 = vadd.f32 %v2657_v40, %v5492_v20  ;;  %v2659_v46 = vpop.f32.mrb[85].mxu0 }
 0x378   :  { %v4120_v47 = vadd.f32 %v2659_v46, %v5496_v43  ;;  %v2661_v63 = vpop.f32.mrb[86].mxu0  ;;  %3061 = vmatprep.mubr.bf16.mxu1 %v2839_v22 }
 0x379   :  { %v4121_v52 = vadd.f32 %v2661_v63, %v5492_v20  ;;  %v2663_v44 = vpop.f32.mrb[87].mxu0  ;;  %3062 = vmatmul.mubr.bf16.gmra.mrb[104].mxu1 %v2838_v21  ;;  %v2786_v27 = vmax.f32 %v4119_v18, 0.0 }
 0x37a   :  { %v4122_v59 = vadd.f32 %v2663_v44, %v5496_v43  ;;  %v2787_v17 = vmax.f32 %v4120_v47, 0.0 }
 0x37b   :  { %v2788_v55 = vmax.f32 %v4121_v52, 0.0 }
 0x37c   :  { %v2789_v33 = vmax.f32 %v4122_v59, 0.0 }
 0x37d   :  { %v2840_v23 = vpack.c.bf16 %v2788_v55, %v2786_v27 }
 0x37e   :  { %v2841_v2 = vpack.c.bf16 %v2789_v33, %v2787_v17  ;;  %v2667_v26 = vpop.f32.mrb[88].mxu0 }
 0x37f   :  { %v4123_v29 = vadd.f32 %v2667_v26, %v5492_v20  ;;  %v2669_v13 = vpop.f32.mrb[89].mxu0 }
 0x380   :  { %v4124_v9 = vadd.f32 %v2669_v13, %v5496_v43  ;;  %v2671_v41 = vpop.f32.mrb[90].mxu0  ;;  %3069 = vmatprep.mubr.bf16.mxu1 %v2841_v2 }
 0x381   :  { %v4125_v34 = vadd.f32 %v2671_v41, %v5492_v20  ;;  %v2673_v19 = vpop.f32.mrb[91].mxu0  ;;  %3070 = vmatmul.mubr.bf16.gmra.mrb[108].mxu1 %v2840_v23  ;;  %v2790_v16 = vmax.f32 %v4123_v29, 0.0 }
 0x382   :  { %v4126_v45 = vadd.f32 %v2673_v19, %v5496_v43  ;;  %v2791_v12 = vmax.f32 %v4124_v9, 0.0 }
 0x383   :  { %v2792_v4 = vmax.f32 %v4125_v34, 0.0 }
 0x384   :  { %v2793_v38 = vmax.f32 %v4126_v45, 0.0 }
 0x385   :  { %v2842_v48 = vpack.c.bf16 %v2792_v4, %v2790_v16 }
 0x386   :  { %v2843_v24 = vpack.c.bf16 %v2793_v38, %v2791_v12  ;;  %v2677_v49 = vpop.f32.mrb[92].mxu0 }
 0x387   :  { %v4127_v32 = vadd.f32 %v2677_v49, %v5492_v20  ;;  %v2679_v30 = vpop.f32.mrb[93].mxu0 }
 0x388   :  { %v4128_v7 = vadd.f32 %v2679_v30, %v5496_v43  ;;  %v2681_v51 = vpop.f32.mrb[94].mxu0  ;;  %3077 = vmatprep.mubr.bf16.mxu1 %v2843_v24  ;;  %v4661_v30 = vld [vmem:[#allocation10 + $0x18] sm:$0xff]  }
 0x389   :  { %v4129_v57 = vadd.f32 %v2681_v51, %v5492_v20  ;;  %v2683_v14 = vpop.f32.mrb[95].mxu0  ;;  %3078 = vmatmul.mubr.bf16.gmra.mrb[112].mxu1 %v2842_v48  ;;  %v2794_v50 = vmax.f32 %v4127_v32, 0.0  ;;  %3865 = vmatprep.subr.bf16.mxu1 %v4661_v30 }
 0x38a   :  { %v4130_v28 = vadd.f32 %v2683_v14, %v5496_v43  ;;  %v2795_v37 = vmax.f32 %v4128_v7, 0.0  ;;  %3866 = vmatpush3.bf16.msra.mxu1 %v4661_v30 }
 0x38b   :  { %v2796_v54 = vmax.f32 %v4129_v57, 0.0 }
 0x38c   :  { %v2797_v61 = vmax.f32 %v4130_v28, 0.0 }
 0x38d   :  { %v2844_v53 = vpack.c.bf16 %v2796_v54, %v2794_v50 }
 0x38e   :  { %v2845_v3 = vpack.c.bf16 %v2797_v61, %v2795_v37  ;;  %v2687_v25 = vpop.f32.mrb[96].mxu0  ;;  %v4662_v37 = vld [vmem:[#allocation10 + $0x20] sm:$0xff]  }
 0x38f   :  { %v4131_v60 = vadd.f32 %v2687_v25, %v5492_v20  ;;  %v2689_v5 = vpop.f32.mrb[97].mxu0  ;;  %3867 = vmatprep.subr.bf16.mxu1 %v4662_v37 }
 0x390   :  { %v4132_v6 = vadd.f32 %v2689_v5, %v5496_v43  ;;  %v2691_v11 = vpop.f32.mrb[98].mxu0  ;;  %3085 = vmatprep.mubr.bf16.mxu1 %v2845_v3  ;;  %3868 = vmatpush3.bf16.msra.mxu1 %v4662_v37 }
 0x391   :  { %v4133_v15 = vadd.f32 %v2691_v11, %v5492_v20  ;;  %v2693_v1 = vpop.f32.mrb[99].mxu0  ;;  %3086 = vmatmul.mubr.bf16.gmra.mrb[116].mxu1 %v2844_v53  ;;  %v2798_v39 = vmax.f32 %v4131_v60, 0.0  ;;  %v4663_v11 = vld [vmem:[#allocation10 + $0x28] sm:$0xff]  }
 0x392   :  { %v4134_v0 = vadd.f32 %v2693_v1, %v5496_v43  ;;  %v2799_v31 = vmax.f32 %v4132_v6, 0.0  ;;  %3869 = vmatprep.subr.bf16.mxu1 %v4663_v11 }
 0x393   :  { %v2800_v8 = vmax.f32 %v4133_v15, 0.0 }
 0x394   :  { %v2801_v35 = vmax.f32 %v4134_v0, 0.0  ;;  %3870 = vmatpush3.bf16.msra.mxu1 %v4663_v11 }
 0x395   :  { %v2846_v36 = vpack.c.bf16 %v2800_v8, %v2798_v39 }
 0x396   :  { %v2847_v56 = vpack.c.bf16 %v2801_v35, %v2799_v31  ;;  %v2697_v10 = vpop.f32.mrb[100].mxu0 }
 0x397   :  { %v4135_v58 = vadd.f32 %v2697_v10, %v5492_v20  ;;  %v2699_v62 = vpop.f32.mrb[101].mxu0 }
 0x398   :  { %v4136_v42 = vadd.f32 %v2699_v62, %v5496_v43  ;;  %v2701_v21 = vpop.f32.mrb[102].mxu0  ;;  %3093 = vmatprep.mubr.bf16.mxu1 %v2847_v56 }
 0x399   :  { %v4137_v22 = vadd.f32 %v2701_v21, %v5492_v20  ;;  %v2703_v40 = vpop.f32.mrb[103].mxu0  ;;  %3094 = vmatmul.mubr.bf16.gmra.mrb[120].mxu1 %v2846_v36  ;;  %v2802_v46 = vmax.f32 %v4135_v58, 0.0  ;;  %v4664_v36 = vld [vmem:[#allocation10 + $0x30] sm:$0xff]  }
 0x39a   :  { %v4138_v18 = vadd.f32 %v2703_v40, %v5496_v43  ;;  %v2803_v63 = vmax.f32 %v4136_v42, 0.0  ;;  %3871 = vmatprep.subr.bf16.mxu1 %v4664_v36  ;;  %v4665_v40 = vld [vmem:[#allocation10 + $0x38] sm:$0xff]  }
 0x39b   :  { %v2804_v47 = vmax.f32 %v4137_v22, 0.0  ;;  %3872 = vmatpush3.bf16.msra.mxu1 %v4664_v36 }
 0x39c   :  { %v2805_v52 = vmax.f32 %v4138_v18, 0.0  ;;  %3873 = vmatprep.subr.bf16.mxu1 %v4665_v40 }
 0x39d   :  { %v2848_v44 = vpack.c.bf16 %v2804_v47, %v2802_v46 }
 0x39e   :  { %v2849_v59 = vpack.c.bf16 %v2805_v52, %v2803_v63  ;;  %v2707_v27 = vpop.f32.mrb[104].mxu0 }
 0x39f   :  { %v4139_v55 = vadd.f32 %v2707_v27, %v5492_v20  ;;  %v2709_v17 = vpop.f32.mrb[105].mxu0  ;;  %3874 = vmatpush3.bf16.msra.mxu1 %v4665_v40 }
 0x3a0   :  { %v4140_v33 = vadd.f32 %v2709_v17, %v5496_v43  ;;  %v2711_v23 = vpop.f32.mrb[106].mxu0  ;;  %3101 = vmatprep.mubr.bf16.mxu1 %v2849_v59 }
 0x3a1   :  { %v4141_v2 = vadd.f32 %v2711_v23, %v5492_v20  ;;  %v2713_v26 = vpop.f32.mrb[107].mxu0  ;;  %3102 = vmatmul.mubr.bf16.gmra.mrb[124].mxu1 %v2848_v44  ;;  %v2806_v13 = vmax.f32 %v4139_v55, 0.0 }
 0x3a2   :  { %v4142_v29 = vadd.f32 %v2713_v26, %v5496_v43  ;;  %v2807_v41 = vmax.f32 %v4140_v33, 0.0 }
 0x3a3   :  { %v2808_v9 = vmax.f32 %v4141_v2, 0.0 }
 0x3a4   :  { %v2809_v34 = vmax.f32 %v4142_v29, 0.0 }
 0x3a5   :  { %v2850_v19 = vpack.c.bf16 %v2808_v9, %v2806_v13 }
 0x3a6   :  { %v2851_v45 = vpack.c.bf16 %v2809_v34, %v2807_v41  ;;  %v2717_v16 = vpop.f32.mrb[108].mxu0 }
 0x3a7   :  { %v4143_v4 = vadd.f32 %v2717_v16, %v5492_v20  ;;  %v2719_v12 = vpop.f32.mrb[109].mxu0 }
 0x3a8   :  { %v4144_v38 = vadd.f32 %v2719_v12, %v5496_v43  ;;  %v2721_v48 = vpop.f32.mrb[110].mxu0  ;;  %3109 = vmatprep.mubr.bf16.mxu1 %v2851_v45 }
 0x3a9   :  { %v4145_v24 = vadd.f32 %v2721_v48, %v5492_v20  ;;  %v2723_v49 = vpop.f32.mrb[111].mxu0  ;;  %3110 = vmatmul.mubr.bf16.gmra.mrb[128].mxu1 %v2850_v19  ;;  %v2810_v7 = vmax.f32 %v4143_v4, 0.0 }
 0x3aa   :  { %v4146_v32 = vadd.f32 %v2723_v49, %v5496_v43  ;;  %v2811_v57 = vmax.f32 %v4144_v38, 0.0 }
 0x3ab   :  { %v2812_v51 = vmax.f32 %v4145_v24, 0.0 }
 0x3ac   :  { %v2813_v14 = vmax.f32 %v4146_v32, 0.0 }
 0x3ad   :  { %v2852_v28 = vpack.c.bf16 %v2812_v51, %v2810_v7 }
 0x3ae   :  { %v2853_v50 = vpack.c.bf16 %v2813_v14, %v2811_v57  ;;  %v2727_v54 = vpop.f32.mrb[112].mxu0 }
 0x3af   :  { %v4147_v61 = vadd.f32 %v2727_v54, %v5492_v20  ;;  %v2729_v53 = vpop.f32.mrb[113].mxu0 }
 0x3b0   :  { %v4148_v3 = vadd.f32 %v2729_v53, %v5496_v43  ;;  %v2731_v25 = vpop.f32.mrb[114].mxu0  ;;  %3117 = vmatprep.mubr.bf16.mxu1 %v2853_v50  ;;  %v5565_v50 = vld [vmem:[%s5657_s6] ss:$0 sm:$0xff] }
 0x3b1   :  { %v4149_v60 = vadd.f32 %v2731_v25, %v5492_v20  ;;  %v2733_v5 = vpop.f32.mrb[115].mxu0  ;;  %3118 = vmatmul.mubr.bf16.gmra.mrb[132].mxu1 %v2852_v28  ;;  %v2814_v15 = vmax.f32 %v4147_v61, 0.0 }
 0x3b2   :  { %v4150_v6 = vadd.f32 %v2733_v5, %v5496_v43  ;;  %v2815_v0 = vmax.f32 %v4148_v3, 0.0 }
 0x3b3   :  { %v2816_v1 = vmax.f32 %v4149_v60, 0.0 }
 0x3b4   :  { %v2817_v39 = vmax.f32 %v4150_v6, 0.0 }
 0x3b5   :  { %v2854_v8 = vpack.c.bf16 %v2816_v1, %v2814_v15 }
 0x3b6   :  { %v2855_v31 = vpack.c.bf16 %v2817_v39, %v2815_v0  ;;  %v2737_v35 = vpop.f32.mrb[116].mxu0 }
 0x3b7   :  { %v4151_v56 = vadd.f32 %v2737_v35, %v5492_v20  ;;  %v2739_v10 = vpop.f32.mrb[117].mxu0 }
 0x3b8   :  { %v4152_v58 = vadd.f32 %v2739_v10, %v5496_v43  ;;  %v2741_v62 = vpop.f32.mrb[118].mxu0  ;;  %3125 = vmatprep.mubr.bf16.mxu1 %v2855_v31 }
 0x3b9   :  { %v4153_v42 = vadd.f32 %v2741_v62, %v5492_v20  ;;  %v2743_v21 = vpop.f32.mrb[119].mxu0  ;;  %3126 = vmatmul.mubr.bf16.gmra.mrb[136].mxu1 %v2854_v8  ;;  %v2818_v18 = vmax.f32 %v4151_v56, 0.0 }
 0x3ba   :  { %v4154_v22 = vadd.f32 %v2743_v21, %v5496_v43  ;;  %v2819_v47 = vmax.f32 %v4152_v58, 0.0 }
 0x3bb   :  { %v2820_v46 = vmax.f32 %v4153_v42, 0.0 }
 0x3bc   :  { %v2821_v63 = vmax.f32 %v4154_v22, 0.0 }
 0x3bd   :  { %v2856_v52 = vpack.c.bf16 %v2820_v46, %v2818_v18 }
 0x3be   :  { %v2857_v44 = vpack.c.bf16 %v2821_v63, %v2819_v47  ;;  %v2747_v59 = vpop.f32.mrb[120].mxu0 }
 0x3bf   :  { %v4155_v27 = vadd.f32 %v2747_v59, %v5492_v20  ;;  %v2749_v55 = vpop.f32.mrb[121].mxu0 }
 0x3c0   :  { %v4156_v17 = vadd.f32 %v2749_v55, %v5496_v43  ;;  %v2751_v33 = vpop.f32.mrb[122].mxu0  ;;  %3133 = vmatprep.mubr.bf16.mxu1 %v2857_v44 }
 0x3c1   :  { %v4157_v23 = vadd.f32 %v2751_v33, %v5492_v20  ;;  %v2753_v2 = vpop.f32.mrb[123].mxu0  ;;  %3134 = vmatmul.mubr.bf16.gmra.mrb[140].mxu1 %v2856_v52  ;;  %v2822_v29 = vmax.f32 %v4155_v27, 0.0 }
 0x3c2   :  { %v4158_v26 = vadd.f32 %v2753_v2, %v5496_v43  ;;  %v2823_v9 = vmax.f32 %v4156_v17, 0.0 }
 0x3c3   :  { %v2824_v13 = vmax.f32 %v4157_v23, 0.0 }
 0x3c4   :  { %v2825_v41 = vmax.f32 %v4158_v26, 0.0 }
 0x3c5   :  { %v2858_v34 = vpack.c.bf16 %v2824_v13, %v2822_v29 }
 0x3c6   :  { %v2859_v19 = vpack.c.bf16 %v2825_v41, %v2823_v9  ;;  %v2757_v45 = vpop.f32.mrb[124].mxu0 }
 0x3c7   :  { %v4159_v16 = vadd.f32 %v2757_v45, %v5492_v20  ;;  %v2759_v4 = vpop.f32.mrb[125].mxu0 }
 0x3c8   :  { %v4160_v12 = vadd.f32 %v2759_v4, %v5496_v43  ;;  %v2761_v38 = vpop.f32.mrb[126].mxu0  ;;  %3141 = vmatprep.mubr.bf16.mxu1 %v2859_v19 }
 0x3c9   :  { %v4161_v48 = vadd.f32 %v2761_v38, %v5492_v20  ;;  %v2763_v24 = vpop.f32.mrb[127].mxu0  ;;  %3142 = vmatmul.mubr.bf16.gmra.mrb[144].mxu1 %v2858_v34  ;;  %v2826_v32 = vmax.f32 %v4159_v16, 0.0 }
 0x3ca   :  { %v4162_v49 = vadd.f32 %v2763_v24, %v5496_v43  ;;  %v2827_v7 = vmax.f32 %v4160_v12, 0.0 }
 0x3cb   :  { %v2828_v30 = vmax.f32 %v4161_v48, 0.0 }
 0x3cc   :  { %v2829_v51 = vmax.f32 %v4162_v49, 0.0 }
 0x3cd   :  { %v2860_v57 = vpack.c.bf16 %v2828_v30, %v2826_v32 }
 0x3ce   :  { %v2861_v14 = vpack.c.bf16 %v2829_v51, %v2827_v7 }
 0x3d0   :  { %3149 = vmatprep.mubr.bf16.mxu1 %v2861_v14 }
 0x3d1   :  { %3150 = vmatmul.mubr.bf16.gmra.mrb[148].mxu1 %v2860_v57 }
 0x42c   :  { %v3739_v28 = vpop.f32.mrb[128].mxu0 }
 0x42d   :  { %v3740_v54 = vpop.f32.mrb[129].mxu0 }
 0x42e   :  { %v3741_v20 = vadd.f32 %v3740_v54, %v3739_v28  ;;  %v3742_v37 = vpop.f32.mrb[130].mxu0 }
 0x42f   :  { %v3743_v61 = vpop.f32.mrb[131].mxu0 }
 0x430   :  { %v3032_v43 = vadd.f32 %v3741_v20, %v5565_v50  ;;  %v3744_v53 = vadd.f32 %v3743_v61, %v3742_v37 }
 0x432   :  { %v3035_v3 = vadd.f32 %v3744_v53, %v5565_v50  ;;  %v3158_v25 = vmax.f32 %v3032_v43, 0.0 }
 0x434   :  { %v3159_v60 = vmax.f32 %v3035_v3, 0.0  ;;  %v3745_v5 = vpop.f32.mrb[132].mxu0 }
 0x435   :  { %v3746_v6 = vpop.f32.mrb[133].mxu0 }
 0x436   :  { %v3747_v11 = vadd.f32 %v3746_v6, %v3745_v5  ;;  %v3748_v15 = vpop.f32.mrb[134].mxu0  ;;  %v3190_v1 = vpack.c.bf16 %v3159_v60, %v3158_v25 }
 0x437   :  { %v3749_v0 = vpop.f32.mrb[135].mxu0 }
 0x438   :  { %v3040_v39 = vadd.f32 %v3747_v11, %v5565_v50  ;;  %v3750_v8 = vadd.f32 %v3749_v0, %v3748_v15  ;;  %3875 = vmatprep.mubr.bf16.mxu1 %v3190_v1 }
 0x43a   :  { %v3043_v31 = vadd.f32 %v3750_v8, %v5565_v50  ;;  %v3160_v35 = vmax.f32 %v3040_v39, 0.0 }
 0x43c   :  { %v3161_v36 = vmax.f32 %v3043_v31, 0.0  ;;  %v3751_v56 = vpop.f32.mrb[96].mxu1 }
 0x43d   :  { %v3752_v10 = vpop.f32.mrb[97].mxu1 }
 0x43e   :  { %v3191_v58 = vpack.c.bf16 %v3161_v36, %v3160_v35  ;;  %v3753_v62 = vadd.f32 %v3752_v10, %v3751_v56  ;;  %v3754_v42 = vpop.f32.mrb[98].mxu1 }
 0x43f   :  { %v3755_v21 = vpop.f32.mrb[99].mxu1 }
 0x440   :  { %v3048_v22 = vadd.f32 %v3753_v62, %v5565_v50  ;;  %v3756_v40 = vadd.f32 %v3755_v21, %v3754_v42  ;;  %3876 = vmatmul.mubr.bf16.vlgmr.msra.gmra.mrb[152].mxu1 %v3191_v58 }
 0x442   :  { %v3051_v18 = vadd.f32 %v3756_v40, %v5565_v50  ;;  %v3162_v46 = vmax.f32 %v3048_v22, 0.0 }
 0x444   :  { %v3163_v47 = vmax.f32 %v3051_v18, 0.0  ;;  %v3757_v63 = vpop.f32.mrb[100].mxu1 }
 0x445   :  { %v3758_v52 = vpop.f32.mrb[101].mxu1 }
 0x446   :  { %v3759_v44 = vadd.f32 %v3758_v52, %v3757_v63  ;;  %v3760_v59 = vpop.f32.mrb[102].mxu1  ;;  %v3192_v27 = vpack.c.bf16 %v3163_v47, %v3162_v46 }
 0x447   :  { %v3761_v55 = vpop.f32.mrb[103].mxu1 }
 0x448   :  { %v3056_v17 = vadd.f32 %v3759_v44, %v5565_v50  ;;  %v3762_v33 = vadd.f32 %v3761_v55, %v3760_v59  ;;  %3879 = vmatprep.mubr.bf16.mxu1 %v3192_v27 }
 0x44a   :  { %v3059_v23 = vadd.f32 %v3762_v33, %v5565_v50  ;;  %v3164_v2 = vmax.f32 %v3056_v17, 0.0 }
 0x44c   :  { %v3165_v26 = vmax.f32 %v3059_v23, 0.0  ;;  %v3763_v29 = vpop.f32.mrb[104].mxu1 }
 0x44d   :  { %v3764_v13 = vpop.f32.mrb[105].mxu1 }
 0x44e   :  { %v3765_v9 = vadd.f32 %v3764_v13, %v3763_v29  ;;  %v3766_v41 = vpop.f32.mrb[106].mxu1  ;;  %v3193_v34 = vpack.c.bf16 %v3165_v26, %v3164_v2 }
 0x44f   :  { %v3767_v19 = vpop.f32.mrb[107].mxu1 }
 0x450   :  { %v3064_v45 = vadd.f32 %v3765_v9, %v5565_v50  ;;  %v3768_v16 = vadd.f32 %v3767_v19, %v3766_v41  ;;  %3880 = vmatmul.mubr.bf16.gmra.mrb[156].mxu1 %v3193_v34 }
 0x452   :  { %v3067_v4 = vadd.f32 %v3768_v16, %v5565_v50  ;;  %v3166_v12 = vmax.f32 %v3064_v45, 0.0 }
 0x454   :  { %v3167_v38 = vmax.f32 %v3067_v4, 0.0  ;;  %v3769_v48 = vpop.f32.mrb[108].mxu1 }
 0x455   :  { %v3770_v24 = vpop.f32.mrb[109].mxu1 }
 0x456   :  { %v3771_v49 = vadd.f32 %v3770_v24, %v3769_v48  ;;  %v3772_v32 = vpop.f32.mrb[110].mxu1  ;;  %v3194_v30 = vpack.c.bf16 %v3167_v38, %v3166_v12 }
 0x457   :  { %v3773_v7 = vpop.f32.mrb[111].mxu1 }
 0x458   :  { %v3072_v51 = vadd.f32 %v3771_v49, %v5565_v50  ;;  %v3774_v57 = vadd.f32 %v3773_v7, %v3772_v32  ;;  %3883 = vmatprep.mubr.bf16.mxu1 %v3194_v30 }
 0x45a   :  { %v3075_v14 = vadd.f32 %v3774_v57, %v5565_v50  ;;  %v3168_v28 = vmax.f32 %v3072_v51, 0.0 }
 0x45c   :  { %v3169_v54 = vmax.f32 %v3075_v14, 0.0  ;;  %v3775_v20 = vpop.f32.mrb[112].mxu1 }
 0x45d   :  { %v3776_v37 = vpop.f32.mrb[113].mxu1 }
 0x45e   :  { %v3777_v61 = vadd.f32 %v3776_v37, %v3775_v20  ;;  %v3778_v43 = vpop.f32.mrb[114].mxu1  ;;  %v3195_v53 = vpack.c.bf16 %v3169_v54, %v3168_v28 }
 0x45f   :  { %v3779_v3 = vpop.f32.mrb[115].mxu1 }
 0x460   :  { %v3080_v25 = vadd.f32 %v3777_v61, %v5565_v50  ;;  %v3780_v60 = vadd.f32 %v3779_v3, %v3778_v43  ;;  %3884 = vmatmul.mubr.bf16.gmra.mrb[160].mxu1 %v3195_v53 }
 0x462   :  { %v3083_v5 = vadd.f32 %v3780_v60, %v5565_v50  ;;  %v3170_v6 = vmax.f32 %v3080_v25, 0.0 }
 0x464   :  { %v3171_v11 = vmax.f32 %v3083_v5, 0.0  ;;  %v3781_v15 = vpop.f32.mrb[116].mxu1 }
 0x465   :  { %v3782_v1 = vpop.f32.mrb[117].mxu1 }
 0x466   :  { %v3783_v0 = vadd.f32 %v3782_v1, %v3781_v15  ;;  %v3784_v39 = vpop.f32.mrb[118].mxu1  ;;  %v3196_v8 = vpack.c.bf16 %v3171_v11, %v3170_v6 }
 0x467   :  { %v3785_v31 = vpop.f32.mrb[119].mxu1 }
 0x468   :  { %v3088_v35 = vadd.f32 %v3783_v0, %v5565_v50  ;;  %v3786_v36 = vadd.f32 %v3785_v31, %v3784_v39  ;;  %3887 = vmatprep.mubr.bf16.mxu1 %v3196_v8 }
 0x46a   :  { %v3091_v56 = vadd.f32 %v3786_v36, %v5565_v50  ;;  %v3172_v10 = vmax.f32 %v3088_v35, 0.0 }
 0x46c   :  { %v3173_v58 = vmax.f32 %v3091_v56, 0.0  ;;  %v3787_v62 = vpop.f32.mrb[120].mxu1 }
 0x46d   :  { %v3788_v42 = vpop.f32.mrb[121].mxu1 }
 0x46e   :  { %v3789_v21 = vadd.f32 %v3788_v42, %v3787_v62  ;;  %v3790_v22 = vpop.f32.mrb[122].mxu1  ;;  %v3197_v40 = vpack.c.bf16 %v3173_v58, %v3172_v10 }
 0x46f   :  { %v3791_v18 = vpop.f32.mrb[123].mxu1 }
 0x470   :  { %v3096_v46 = vadd.f32 %v3789_v21, %v5565_v50  ;;  %v3792_v47 = vadd.f32 %v3791_v18, %v3790_v22  ;;  %3888 = vmatmul.mubr.bf16.gmra.mrb[164].mxu1 %v3197_v40 }
 0x472   :  { %v3099_v63 = vadd.f32 %v3792_v47, %v5565_v50  ;;  %v3174_v52 = vmax.f32 %v3096_v46, 0.0 }
 0x474   :  { %v3175_v44 = vmax.f32 %v3099_v63, 0.0  ;;  %v3793_v59 = vpop.f32.mrb[124].mxu1 }
 0x475   :  { %v3794_v27 = vpop.f32.mrb[125].mxu1 }
 0x476   :  { %v3795_v55 = vadd.f32 %v3794_v27, %v3793_v59  ;;  %v3796_v17 = vpop.f32.mrb[126].mxu1  ;;  %v3198_v33 = vpack.c.bf16 %v3175_v44, %v3174_v52 }
 0x477   :  { %v3797_v23 = vpop.f32.mrb[127].mxu1 }
 0x478   :  { %v3104_v2 = vadd.f32 %v3795_v55, %v5565_v50  ;;  %v3798_v26 = vadd.f32 %v3797_v23, %v3796_v17  ;;  %3891 = vmatprep.mubr.bf16.mxu1 %v3198_v33 }
 0x47a   :  { %v3107_v29 = vadd.f32 %v3798_v26, %v5565_v50  ;;  %v3176_v13 = vmax.f32 %v3104_v2, 0.0 }
 0x47c   :  { %v3177_v9 = vmax.f32 %v3107_v29, 0.0  ;;  %v3799_v41 = vpop.f32.mrb[128].mxu1 }
 0x47d   :  { %v3800_v34 = vpop.f32.mrb[129].mxu1 }
 0x47e   :  { %v3801_v19 = vadd.f32 %v3800_v34, %v3799_v41  ;;  %v3802_v45 = vpop.f32.mrb[130].mxu1  ;;  %v3199_v16 = vpack.c.bf16 %v3177_v9, %v3176_v13 }
 0x47f   :  { %v3803_v4 = vpop.f32.mrb[131].mxu1 }
 0x480   :  { %v3112_v12 = vadd.f32 %v3801_v19, %v5565_v50  ;;  %v3804_v38 = vadd.f32 %v3803_v4, %v3802_v45  ;;  %3892 = vmatmul.mubr.bf16.gmra.mrb[168].mxu1 %v3199_v16  ;;  %v5602_v16 = vld [vmem:[%s5659_s8] ss:$0 sm:$0xff]  ;;  %s4824_s8 = smov [#allocation11]  }
 0x481   :  { %s3475_s13 = sshll.u32 %s4824_s8, 4  ;;  %s3476_s13 = int_to_ptr.vmem [resolvable:$true] %s3475_s13 }
 0x482   :  { %v3115_v48 = vadd.f32 %v3804_v38, %v5565_v50  ;;  %v3178_v24 = vmax.f32 %v3112_v12, 0.0  ;;  %s4780_s14 = scalar_lea.vmem %s3476_s13, 4096  ;;  %p4785_p13 = scmp.lt.s32.totalorder %s3476_s13, %s3476_s13 }
 0x483   :  { %p4781_p12 = scmp.ne.s32.totalorder %s3476_s13, %s4780_s14  ;;  %p4786_p0 = scmp.lt.s32.totalorder %s4780_s14, %s4780_s14 }
 0x484   :  { %v3179_v49 = vmax.f32 %v3115_v48, 0.0  ;;  %v3805_v32 = vpop.f32.mrb[132].mxu1 }
 0x485   :  { %v3806_v30 = vpop.f32.mrb[133].mxu1  ;;  %p4787_p1 = por %p4786_p0, %p4785_p13 }
 0x486   :  { %v3807_v7 = vadd.f32 %v3806_v30, %v3805_v32  ;;  %v3808_v51 = vpop.f32.mrb[134].mxu1  ;;  %v3200_v57 = vpack.c.bf16 %v3179_v49, %v3178_v24 }
 0x487   :  { %v3809_v14 = vpop.f32.mrb[135].mxu1  ;;  %p4788_p2 = pnand %p4787_p1, %p4781_p12 }
 0x488   :  { %v3120_v28 = vadd.f32 %v3807_v7, %v5565_v50  ;;  %v3810_v54 = vadd.f32 %v3809_v14, %v3808_v51  ;;  %3895 = vmatprep.mubr.bf16.mxu1 %v3200_v57 }
 0x48a   :  { %v3123_v20 = vadd.f32 %v3810_v54, %v5565_v50  ;;  %v3180_v37 = vmax.f32 %v3120_v28, 0.0 }
 0x48c   :  { %v3181_v61 = vmax.f32 %v3123_v20, 0.0  ;;  %v3811_v43 = vpop.f32.mrb[136].mxu1 }
 0x48d   :  { %v3812_v53 = vpop.f32.mrb[137].mxu1 }
 0x48e   :  { %v3813_v3 = vadd.f32 %v3812_v53, %v3811_v43  ;;  %v3814_v25 = vpop.f32.mrb[138].mxu1  ;;  %v3201_v60 = vpack.c.bf16 %v3181_v61, %v3180_v37 }
 0x48f   :  { %v3815_v5 = vpop.f32.mrb[139].mxu1 }
 0x490   :  { %v3128_v6 = vadd.f32 %v3813_v3, %v5565_v50  ;;  %v3816_v11 = vadd.f32 %v3815_v5, %v3814_v25  ;;  %3896 = vmatmul.mubr.bf16.gmra.mrb[172].mxu1 %v3201_v60 }
 0x492   :  { %v3131_v15 = vadd.f32 %v3816_v11, %v5565_v50  ;;  %v3182_v1 = vmax.f32 %v3128_v6, 0.0 }
 0x494   :  { %v3183_v0 = vmax.f32 %v3131_v15, 0.0  ;;  %v3817_v39 = vpop.f32.mrb[140].mxu1 }
 0x495   :  { %v3818_v8 = vpop.f32.mrb[141].mxu1 }
 0x496   :  { %v3819_v31 = vadd.f32 %v3818_v8, %v3817_v39  ;;  %v3820_v35 = vpop.f32.mrb[142].mxu1  ;;  %v3202_v36 = vpack.c.bf16 %v3183_v0, %v3182_v1 }
 0x497   :  { %v3821_v56 = vpop.f32.mrb[143].mxu1 }
 0x498   :  { %v3136_v10 = vadd.f32 %v3819_v31, %v5565_v50  ;;  %v3822_v58 = vadd.f32 %v3821_v56, %v3820_v35  ;;  %3899 = vmatprep.mubr.bf16.mxu1 %v3202_v36 }
 0x49a   :  { %v3139_v62 = vadd.f32 %v3822_v58, %v5565_v50  ;;  %v3184_v42 = vmax.f32 %v3136_v10, 0.0 }
 0x49c   :  { %v3185_v21 = vmax.f32 %v3139_v62, 0.0  ;;  %v3823_v22 = vpop.f32.mrb[144].mxu1 }
 0x49d   :  { %v3824_v40 = vpop.f32.mrb[145].mxu1 }
 0x49e   :  { %v3825_v18 = vadd.f32 %v3824_v40, %v3823_v22  ;;  %v3826_v46 = vpop.f32.mrb[146].mxu1  ;;  %v3203_v47 = vpack.c.bf16 %v3185_v21, %v3184_v42 }
 0x49f   :  { %v3827_v63 = vpop.f32.mrb[147].mxu1 }
 0x4a0   :  { %v3144_v52 = vadd.f32 %v3825_v18, %v5565_v50  ;;  %v3828_v44 = vadd.f32 %v3827_v63, %v3826_v46  ;;  %3900 = vmatmul.mubr.bf16.gmra.mrb[176].mxu1 %v3203_v47 }
 0x4a2   :  { %v3147_v59 = vadd.f32 %v3828_v44, %v5565_v50  ;;  %v3186_v27 = vmax.f32 %v3144_v52, 0.0 }
 0x4a4   :  { %v3187_v55 = vmax.f32 %v3147_v59, 0.0  ;;  %v3829_v17 = vpop.f32.mrb[148].mxu1 }
 0x4a5   :  { %v3830_v33 = vpop.f32.mrb[149].mxu1 }
 0x4a6   :  { %v3831_v23 = vadd.f32 %v3830_v33, %v3829_v17  ;;  %v3832_v2 = vpop.f32.mrb[150].mxu1  ;;  %v3204_v26 = vpack.c.bf16 %v3187_v55, %v3186_v27 }
 0x4a7   :  { %v3833_v29 = vpop.f32.mrb[151].mxu1 }
 0x4a8   :  { %v3152_v13 = vadd.f32 %v3831_v23, %v5565_v50  ;;  %v3834_v9 = vadd.f32 %v3833_v29, %v3832_v2  ;;  %3903 = vmatprep.mubr.bf16.mxu1 %v3204_v26 }
 0x4aa   :  { %v3155_v41 = vadd.f32 %v3834_v9, %v5565_v50  ;;  %v3188_v34 = vmax.f32 %v3152_v13, 0.0 }
 0x4ac   :  { %v3189_v19 = vmax.f32 %v3155_v41, 0.0 }
 0x4ae   :  { %v3205_v45 = vpack.c.bf16 %v3189_v19, %v3188_v34 }
 0x4b0   :  { %3904 = vmatmul.mubr.bf16.gmra.mrb[180].mxu1 %v3205_v45 }
 0x513   :  { %v3877_v4 = vpop.f32.mrb[152].mxu1 }
 0x514   :  { %v3320_v12 = vadd.f32 %v3877_v4, %v5602_v16  ;;  %v3311_v38 = vpop.f32.mrb[153].mxu1 }
 0x515   :  { %v3312_v48 = vadd.f32 %v5602_v16, %v3311_v38  ;;  %v3878_v24 = vpop.f32.mrb[154].mxu1 }
 0x516   :  { %3440 = vst [vmem:[#allocation11 + $0x10] sm:$0xff] %v3320_v12  ;;  %v3323_v49 = vadd.f32 %v3878_v24, %v5602_v16  ;;  %v3314_v50 = vpop.f32.mrb[155].mxu1 }
 0x517   :  { %3438 = vst [vmem:[#allocation11] sm:$0xff] %v3312_v48  ;;  %v3315_v32 = vadd.f32 %v5602_v16, %v3314_v50 }
 0x518   :  { %3441 = vst [vmem:[#allocation11 + $0x18] sm:$0xff] %v3323_v49 }
 0x519   :  { %3439 = vst [vmem:[#allocation11 + $0x8] sm:$0xff] %v3315_v32 }
 0x523   :  { %v3881_v30 = vpop.f32.mrb[156].mxu1 }
 0x524   :  { %v3336_v7 = vadd.f32 %v3881_v30, %v5602_v16  ;;  %v3327_v51 = vpop.f32.mrb[157].mxu1 }
 0x525   :  { %v3328_v57 = vadd.f32 %v5602_v16, %v3327_v51  ;;  %v3882_v14 = vpop.f32.mrb[158].mxu1 }
 0x526   :  { %3444 = vst [vmem:[#allocation11 + $0x30] sm:$0xff] %v3336_v7  ;;  %v3339_v28 = vadd.f32 %v3882_v14, %v5602_v16  ;;  %v3330_v54 = vpop.f32.mrb[159].mxu1 }
 0x527   :  { %3442 = vst [vmem:[#allocation11 + $0x20] sm:$0xff] %v3328_v57  ;;  %v3331_v20 = vadd.f32 %v5602_v16, %v3330_v54 }
 0x528   :  { %3445 = vst [vmem:[#allocation11 + $0x38] sm:$0xff] %v3339_v28 }
 0x529   :  { %3443 = vst [vmem:[#allocation11 + $0x28] sm:$0xff] %v3331_v20 }
 0x533   :  { %v3885_v37 = vpop.f32.mrb[160].mxu1 }
 0x534   :  { %v3352_v61 = vadd.f32 %v3885_v37, %v5602_v16  ;;  %v3343_v43 = vpop.f32.mrb[161].mxu1 }
 0x535   :  { %v3344_v53 = vadd.f32 %v5602_v16, %v3343_v43  ;;  %v3886_v3 = vpop.f32.mrb[162].mxu1 }
 0x536   :  { %3448 = vst [vmem:[#allocation11 + $0x50] sm:$0xff] %v3352_v61  ;;  %v3355_v25 = vadd.f32 %v3886_v3, %v5602_v16  ;;  %v3346_v60 = vpop.f32.mrb[163].mxu1 }
 0x537   :  { %3446 = vst [vmem:[#allocation11 + $0x40] sm:$0xff] %v3344_v53  ;;  %v3347_v5 = vadd.f32 %v5602_v16, %v3346_v60 }
 0x538   :  { %3449 = vst [vmem:[#allocation11 + $0x58] sm:$0xff] %v3355_v25 }
 0x539   :  { %3447 = vst [vmem:[#allocation11 + $0x48] sm:$0xff] %v3347_v5 }
 0x543   :  { %v3889_v6 = vpop.f32.mrb[164].mxu1 }
 0x544   :  { %v3368_v11 = vadd.f32 %v3889_v6, %v5602_v16  ;;  %v3359_v15 = vpop.f32.mrb[165].mxu1 }
 0x545   :  { %v3360_v1 = vadd.f32 %v5602_v16, %v3359_v15  ;;  %v3890_v0 = vpop.f32.mrb[166].mxu1 }
 0x546   :  { %3452 = vst [vmem:[#allocation11 + $0x70] sm:$0xff] %v3368_v11  ;;  %v3371_v39 = vadd.f32 %v3890_v0, %v5602_v16  ;;  %v3362_v8 = vpop.f32.mrb[167].mxu1 }
 0x547   :  { %3450 = vst [vmem:[#allocation11 + $0x60] sm:$0xff] %v3360_v1  ;;  %v3363_v31 = vadd.f32 %v5602_v16, %v3362_v8 }
 0x548   :  { %3453 = vst [vmem:[#allocation11 + $0x78] sm:$0xff] %v3371_v39 }
 0x549   :  { %3451 = vst [vmem:[#allocation11 + $0x68] sm:$0xff] %v3363_v31 }
 0x553   :  { %v3893_v35 = vpop.f32.mrb[168].mxu1 }
 0x554   :  { %v3384_v36 = vadd.f32 %v3893_v35, %v5602_v16  ;;  %v3375_v56 = vpop.f32.mrb[169].mxu1 }
 0x555   :  { %v3376_v10 = vadd.f32 %v5602_v16, %v3375_v56  ;;  %v3894_v58 = vpop.f32.mrb[170].mxu1 }
 0x556   :  { %3456 = vst [vmem:[#allocation11 + $0x90] sm:$0xff] %v3384_v36  ;;  %v3387_v62 = vadd.f32 %v3894_v58, %v5602_v16  ;;  %v3378_v42 = vpop.f32.mrb[171].mxu1 }
 0x557   :  { %3454 = vst [vmem:[#allocation11 + $0x80] sm:$0xff] %v3376_v10  ;;  %v3379_v21 = vadd.f32 %v5602_v16, %v3378_v42 }
 0x558   :  { %3457 = vst [vmem:[#allocation11 + $0x98] sm:$0xff] %v3387_v62 }
 0x559   :  { %3455 = vst [vmem:[#allocation11 + $0x88] sm:$0xff] %v3379_v21 }
 0x563   :  { %v3897_v22 = vpop.f32.mrb[172].mxu1 }
 0x564   :  { %v3400_v40 = vadd.f32 %v3897_v22, %v5602_v16  ;;  %v3391_v18 = vpop.f32.mrb[173].mxu1 }
 0x565   :  { %v3392_v46 = vadd.f32 %v5602_v16, %v3391_v18  ;;  %v3898_v47 = vpop.f32.mrb[174].mxu1 }
 0x566   :  { %3460 = vst [vmem:[#allocation11 + $0xb0] sm:$0xff] %v3400_v40  ;;  %v3403_v63 = vadd.f32 %v3898_v47, %v5602_v16  ;;  %v3394_v52 = vpop.f32.mrb[175].mxu1 }
 0x567   :  { %3458 = vst [vmem:[#allocation11 + $0xa0] sm:$0xff] %v3392_v46  ;;  %v3395_v44 = vadd.f32 %v5602_v16, %v3394_v52 }
 0x568   :  { %3461 = vst [vmem:[#allocation11 + $0xb8] sm:$0xff] %v3403_v63 }
 0x569   :  { %3459 = vst [vmem:[#allocation11 + $0xa8] sm:$0xff] %v3395_v44 }
 0x573   :  { %v3901_v59 = vpop.f32.mrb[176].mxu1 }
 0x574   :  { %v3416_v27 = vadd.f32 %v3901_v59, %v5602_v16  ;;  %v3407_v55 = vpop.f32.mrb[177].mxu1 }
 0x575   :  { %v3408_v17 = vadd.f32 %v5602_v16, %v3407_v55  ;;  %v3902_v33 = vpop.f32.mrb[178].mxu1 }
 0x576   :  { %3464 = vst [vmem:[#allocation11 + $0xd0] sm:$0xff] %v3416_v27  ;;  %v3419_v23 = vadd.f32 %v3902_v33, %v5602_v16  ;;  %v3410_v2 = vpop.f32.mrb[179].mxu1 }
 0x577   :  { %3462 = vst [vmem:[#allocation11 + $0xc0] sm:$0xff] %v3408_v17  ;;  %v3411_v26 = vadd.f32 %v5602_v16, %v3410_v2 }
 0x578   :  { %3465 = vst [vmem:[#allocation11 + $0xd8] sm:$0xff] %v3419_v23 }
 0x579   :  { %3463 = vst [vmem:[#allocation11 + $0xc8] sm:$0xff] %v3411_v26 }
 0x583   :  { %v3905_v29 = vpop.f32.mrb[180].mxu1 }
 0x584   :  { %v3432_v13 = vadd.f32 %v3905_v29, %v5602_v16  ;;  %v3423_v9 = vpop.f32.mrb[181].mxu1 }
 0x585   :  { %v3424_v41 = vadd.f32 %v5602_v16, %v3423_v9  ;;  %v3906_v34 = vpop.f32.mrb[182].mxu1 }
 0x586   :  { %3468 = vst [vmem:[#allocation11 + $0xf0] sm:$0xff] %v3432_v13  ;;  %v3435_v19 = vadd.f32 %v3906_v34, %v5602_v16  ;;  %v3426_v45 = vpop.f32.mrb[183].mxu1 }
 0x587   :  { %3466 = vst [vmem:[#allocation11 + $0xe0] sm:$0xff] %v3424_v41  ;;  %v3427_v4 = vadd.f32 %v5602_v16, %v3426_v45 }
 0x588   :  { %3469 = vst [vmem:[#allocation11 + $0xf8] sm:$0xff] %v3435_v19 }
 0x589   :  { %3467 = vst [vmem:[#allocation11 + $0xe8] sm:$0xff] %v3427_v4 }
 0x58a   :  { %4791 = shalt.err (!%p4788_p2)
}
 0x58b   :  { %s4792_s18 = scalar_lea.hbm %s5660_s9, 4096 }
 0x58c   :  { %p4793_p3 = scmp.ne.s32.totalorder %s5660_s9, %s4792_s18  ;;  %p4796_p4 = scmp.lt.u32.totalorder %s4792_s18, %s5660_s9 }
 0x58e   :  { %p4798_p5 = pnand %p4796_p4, %p4793_p3 }
 0x590   :  { %4801 = shalt.err (!%p4798_p5)
}
 0x591   :  { %3481 = dma.vmem_to_hbm [thread:$0]  %s3476_s13, 4096, %s5660_s9, [#allocation4], %s4820_s0, %s4820_s0, %s4821_s16  }
 0x592   :  { %4808 = dma.done.wait [#allocation4], 4096  }
 0x593   :  { %4809 = vsyncadd [#allocation4], 4294963200 }
 0x594   :  { %3485 = vsyncpa [#allocation3], 1 }
 0x595   :  { %3486 = vsyncpa [#allocation6], 1 }
 0x596   :  { %3487 = vsyncpa [#allocation9], 1 }
 0x597   :  { %3488 = vsyncpa [#allocation4], 1 }

</bundles_post_ra>
